<compile_context>
chip_gen: v7x
topology: tpu7x:2x2x1
jax: 0.10.0
libtpu: 0.0.40
codegen_flags: <defaults>
</compile_context>

<pallas_src>
import numpy as np

import jax
import jax.numpy as jnp
from jax import lax
from jax.experimental import pallas as pl
from jax.experimental.pallas import tpu as pltpu

# ---------------- static problem sizes (derived from the module) ----------------
B = 2
C_IN = 3
L_IN = 150                      # chosen so flatten size == conv[2] * 13 == 52
CONV = [8, 8, 4]
K_SIZES = [15, 9, 5]
FC = 96
OUT = 17
EPS = 1e-5

L1C = L_IN - K_SIZES[0] + 1     # 136
L1P = L1C // 2                  # 68
L2C = L1P - K_SIZES[1] + 1      # 60
L2P = L2C // 2                  # 30
L3C = L2P - K_SIZES[2] + 1      # 26
L3P = L3C // 2                  # 13
FLAT = CONV[2] * L3P            # 52

LW1 = CONV[0] * L1P             # 544  (layer1 pooled, channel-major flat)
LW2 = CONV[1] * L2P             # 240
LW3 = CONV[2] * L3P             # 52


def _rup(n, m=128):
    return ((n + m - 1) // m) * m


PW1 = _rup(LW1)                 # 640  lane-padded layer1 width
PW2 = _rup(LW2)                 # 256
PW3 = _rup(LW3)                 # 128
FC_P = _rup(FC)                 # 128
OUT_P = _rup(OUT)               # 128
KP1 = C_IN * L_IN               # 450  layer-1 contraction width (x stays unpadded)


# ---------------- the fused kernel ----------------------------------------------
def tiny_net_kernel(x_ref, t1_ref,
                    b1_ref, b2_ref, b3_ref, bf1_ref, bf2_ref,
                    t2_hbm, t3_hbm, wf1_hbm, wf2_hbm,
                    out_ref, l1_ref, l2_ref,
                    t2_buf, t3_buf, wf1_buf, wf2_buf, sem):
    f32 = jnp.float32
    bf16 = jnp.bfloat16

    # ---- prefetch later-layer weights (HBM -> VMEM) behind layer-1 compute ------
    cp_t2 = pltpu.make_async_copy(t2_hbm, t2_buf, sem.at[0]); cp_t2.start()
    cp_t3 = pltpu.make_async_copy(t3_hbm, t3_buf, sem.at[1]); cp_t3.start()
    cp_f1 = pltpu.make_async_copy(wf1_hbm, wf1_buf, sem.at[2]); cp_f1.start()
    cp_f2 = pltpu.make_async_copy(wf2_hbm, wf2_buf, sem.at[3]); cp_f2.start()

    # ---- layer 1: BN0+conv(3->8,k=15)+BN1+bias folded into one merged even|odd
    #      Toeplitz matmul; ReLU; MaxPool(2,2) == elementwise max of the halves ---
    x = x_ref[...].astype(bf16)                              # (B, 450)
    h1 = jnp.dot(x, t1_ref[...], preferred_element_type=f32) + b1_ref[...]
    h1 = jnp.maximum(h1, 0.0)                                # (B, 1280)
    p1 = jnp.maximum(h1[:, :PW1], h1[:, PW1:])               # (B, 640) lanes 544+ are 0
    l1_ref[...] = p1

    # ---- layer 2 ----------------------------------------------------------------
    cp_t2.wait()
    h2 = jnp.dot(p1.astype(bf16), t2_buf[...], preferred_element_type=f32) + b2_ref[...]
    h2 = jnp.maximum(h2, 0.0)                                # (B, 512)
    p2 = jnp.maximum(h2[:, :PW2], h2[:, PW2:])               # (B, 256) lanes 240+ are 0
    l2_ref[...] = p2

    # ---- layer 3 ----------------------------------------------------------------
    cp_t3.wait()
    h3 = jnp.dot(p2.astype(bf16), t3_buf[...], preferred_element_type=f32) + b3_ref[...]
    h3 = jnp.maximum(h3, 0.0)                                # (B, 256)
    p3 = jnp.maximum(h3[:, :PW3], h3[:, PW3:])               # (B, 128) == torch flatten

    # ---- fc1 (+relu), fc2; dropout = identity in eval mode ----------------------
    cp_f1.wait()
    h = jnp.dot(p3.astype(bf16), wf1_buf[...], preferred_element_type=f32) + bf1_ref[...]
    h = jnp.maximum(h, 0.0)                                  # (B, 128)

    cp_f2.wait()
    out = jnp.dot(h.astype(bf16), wf2_buf[...], preferred_element_type=f32) + bf2_ref[...]
    out_ref[...] = out.astype(out_ref.dtype)                 # (B, 128)


# ---------------- wrapper --------------------------------------------------------
def tiny_net_forward(x, kernel_params):
    nb = x.shape[0]
    x_flat = x.reshape(nb, C_IN * L_IN)          # channel-major flatten (row-major)

    out_shapes = (
        jax.ShapeDtypeStruct((nb, OUT_P), jnp.float32),   # logits, lane-padded
        jax.ShapeDtypeStruct((nb, PW1), jnp.float32),     # layer1 as lane-dense slab
        jax.ShapeDtypeStruct((nb, PW2), jnp.float32),     # layer2 as lane-dense slab
    )
    vmem = pl.BlockSpec(memory_space=pltpu.MemorySpace.VMEM)
    hbm = pl.BlockSpec(memory_space=pl.ANY)

    fn = pl.pallas_call(
        tiny_net_kernel,
        out_shape=out_shapes,
        in_specs=[vmem,                     # x
                  vmem,                     # merged Toeplitz, layer 1
                  vmem, vmem, vmem, vmem, vmem,   # 5 lane-padded biases
                  hbm, hbm, hbm, hbm],      # layer-2/3/fc weights: manual DMA
        out_specs=(vmem, vmem, vmem),
        scratch_shapes=[
            pltpu.VMEM((PW1, 2 * PW2), jnp.bfloat16),   # T2 buffer (640, 512)
            pltpu.VMEM((PW2, 2 * PW3), jnp.bfloat16),   # T3 buffer (256, 256)
            pltpu.VMEM((PW3, FC_P), jnp.bfloat16),      # fc1 weights (128, 128)
            pltpu.VMEM((FC_P, OUT_P), jnp.bfloat16),    # fc2 weights (128, 128)
            pltpu.SemaphoreType.DMA((4,)),
        ],
    )
    out_p, l1_p, l2_p = fn(x_flat, *kernel_params)

    out = out_p[:, :OUT]
    l1 = l1_p[:, :LW1].reshape(nb, CONV[0], L1P)
    l2 = l2_p[:, :LW2].reshape(nb, CONV[1], L2P)
    return out, l1, l2


# ---------------- deterministic parameter construction ---------------------------
def make_torch_params(key):
    ks = list(jax.random.split(key, 12))

    def bn(k, c):
        k1, k2, k3, k4 = jax.random.split(k, 4)
        gamma = jax.random.uniform(k1, (c,), minval=0.5, maxval=1.5)
        beta = jax.random.normal(k2, (c,)) * 0.1
        rmean = jax.random.normal(k3, (c,)) * 0.1
        rvar = jax.random.uniform(k4, (c,), minval=0.5, maxval=1.5)
        return gamma, beta, rmean, rvar

    p = {}
    p['bn0'] = bn(ks[0], C_IN)
    p['w1'] = jax.random.normal(ks[1], (CONV[0], C_IN, K_SIZES[0])) / jnp.sqrt(C_IN * K_SIZES[0])
    p['b1'] = jax.random.normal(ks[2], (CONV[0],)) * 0.1
    p['bn1'] = bn(ks[3], CONV[0])
    p['w2'] = jax.random.normal(ks[4], (CONV[1], CONV[0], K_SIZES[1])) / jnp.sqrt(CONV[0] * K_SIZES[1])
    p['b2'] = jax.random.normal(ks[5], (CONV[1],)) * 0.1
    p['bn2'] = bn(ks[6], CONV[1])
    p['w3'] = jax.random.normal(ks[7], (CONV[2], CONV[1], K_SIZES[2])) / jnp.sqrt(CONV[1] * K_SIZES[2])
    p['b3'] = jax.random.normal(ks[8], (CONV[2],)) * 0.1
    p['bn3'] = bn(ks[9], CONV[2])
    p['fc1_w'] = jax.random.normal(ks[10], (FC, FLAT)) / jnp.sqrt(FLAT)
    ka, kb, kc = jax.random.split(ks[11], 3)
    p['fc1_b'] = jax.random.normal(ka, (FC,)) * 0.1
    p['fc2_w'] = jax.random.normal(kb, (OUT, FC)) / jnp.sqrt(FC)
    p['fc2_b'] = jax.random.normal(kc, (OUT,)) * 0.1
    return p


# ---------------- host-side folding: BN + bias -> merged even/odd Toeplitz --------
def build_kernel_params(p):
    def np32(a):
        return np.asarray(jax.device_get(a), dtype=np.float32)

    # input BatchNorm1d(3) (eval) folded to per-channel scale/shift
    g0, be0, m0, v0 = [np32(a) for a in p['bn0']]
    s0 = g0 / np.sqrt(v0 + EPS)
    t0 = be0 - m0 * s0

    def bn_fold(bn):
        g, be, m, v = [np32(a) for a in bn]
        s = g / np.sqrt(v + EPS)
        return s, be - m * s

    s1, d1 = bn_fold(p['bn1'])
    s2, d2 = bn_fold(p['bn2'])
    s3, d3 = bn_fold(p['bn3'])

    w1, b1 = np32(p['w1']), np32(p['b1'])            # (8,3,15), (8,)
    w2, b2 = np32(p['w2']), np32(p['b2'])            # (8,8,9),  (8,)
    w3, b3 = np32(p['w3']), np32(p['b3'])            # (4,8,5),  (4,)

    # effective conv weights / per-output-channel biases (eval BN folded)
    W1eff = s1[:, None, None] * w1 * s0[None, :, None]
    B1eff = s1 * (b1 + np.einsum('ock,c->o', w1, t0)) + d1
    W2eff = s2[:, None, None] * w2
    B2eff = s2 * b2 + d2
    W3eff = s3[:, None, None] * w3
    B3eff = s3 * b3 + d3

    def toeplitz_merged(Weff, Beff, Lin, k_pad, half_pad):
        """Weff: (Cout, Cin, K). Builds a single (k_pad, 2*half_pad) RHS whose
        lanes [0:half_pad] are the EVEN pooled conv positions and lanes
        [half_pad:2*half_pad] are the ODD ones (channel-major, zero-padded
        identically), plus the matching (1, 2*half_pad) bias row."""
        Cout, Cin, K = Weff.shape
        Lout = Lin - K + 1
        Lp = Lout // 2
        T = np.zeros((Cin * Lin, Cout * Lout), dtype=np.float32)
        l = np.arange(Lout)
        for o in range(Cout):
            for c in range(Cin):
                for k in range(K):
                    T[c * Lin + l + k, o * Lout + l] = Weff[o, c, k]
        T3 = T.reshape(Cin * Lin, Cout, Lout)
        Te = T3[:, :, 0::2].reshape(Cin * Lin, Cout * Lp)
        To = T3[:, :, 1::2].reshape(Cin * Lin, Cout * Lp)
        Tm = np.zeros((k_pad, 2 * half_pad), dtype=np.float32)
        Tm[:Cin * Lin, :Cout * Lp] = Te
        Tm[:Cin * Lin, half_pad:half_pad + Cout * Lp] = To
        Bm = np.zeros((1, 2 * half_pad), dtype=np.float32)
        Bm[0, :Cout * Lp] = np.repeat(Beff, Lp)
        Bm[0, half_pad:half_pad + Cout * Lp] = np.repeat(Beff, Lp)
        return Tm, Bm

    T1, bias1 = toeplitz_merged(W1eff, B1eff, L_IN, KP1, PW1)   # (450,1280),(1,1280)
    T2, bias2 = toeplitz_merged(W2eff, B2eff, L1P, PW1, PW2)    # (640, 512),(1, 512)
    T3, bias3 = toeplitz_merged(W3eff, B3eff, L2P, PW2, PW3)    # (256, 256),(1, 256)

    Wfc1 = np.zeros((PW3, FC_P), dtype=np.float32)              # (128,128)
    Wfc1[:FLAT, :FC] = np32(p['fc1_w']).T
    bias4 = np.zeros((1, FC_P), dtype=np.float32)
    bias4[0, :FC] = np32(p['fc1_b'])

    Wfc2 = np.zeros((FC_P, OUT_P), dtype=np.float32)            # (128,128)
    Wfc2[:FC, :OUT] = np32(p['fc2_w']).T
    bias5 = np.zeros((1, OUT_P), dtype=np.float32)
    bias5[0, :OUT] = np32(p['fc2_b'])

    # Weights shipped as bf16 (halves weight DMA, native MXU pass); biases f32.
    w_bf16 = tuple(jnp.asarray(a, dtype=jnp.bfloat16) for a in (T1, T2, T3, Wfc1, Wfc2))
    b_f32 = tuple(jnp.asarray(a, dtype=jnp.float32) for a in (bias1, bias2, bias3, bias4, bias5))
    # call-order: T1, b1..b5, T2, T3, Wfc1, Wfc2
    return (w_bf16[0],) + b_f32 + w_bf16[1:]


# ---------------- pure-JAX reference (torch eval semantics, f32 HIGHEST) ----------
def ref_forward(x, p):
    hi = lax.Precision.HIGHEST

    def bn(h, prm):
        g, b, m, v = prm
        return (h - m[None, :, None]) / jnp.sqrt(v[None, :, None] + EPS) * g[None, :, None] + b[None, :, None]

    def conv1d(h, w, b):
        y = lax.conv_general_dilated(h, w, window_strides=(1,), padding='VALID',
                                     dimension_numbers=('NCH', 'OIH', 'NCH'), precision=hi)
        return y + b[None, :, None]

    def maxpool2(h):
        return lax.reduce_window(h, -jnp.inf, lax.max, (1, 1, 2), (1, 1, 2), 'VALID')

    h = bn(x, p['bn0'])
    h = conv1d(h, p['w1'], p['b1']); h = bn(h, p['bn1']); h = jnp.maximum(h, 0.0); l1 = maxpool2(h)
    h = conv1d(l1, p['w2'], p['b2']); h = bn(h, p['bn2']); h = jnp.maximum(h, 0.0); l2 = maxpool2(h)
    h = conv1d(l2, p['w3'], p['b3']); h = bn(h, p['bn3']); h = jnp.maximum(h, 0.0); l3 = maxpool2(h)
    flat = l3.reshape(l3.shape[0], -1)
    h = jnp.maximum(jnp.dot(flat, p['fc1_w'].T, precision=hi) + p['fc1_b'][None, :], 0.0)
    out = jnp.dot(h, p['fc2_w'].T, precision=hi) + p['fc2_b'][None, :]
    return out, l1, l2


# ---------------- main ------------------------------------------------------------
if __name__ == "__main__":
    key = jax.random.PRNGKey(0)
    kx, kp = jax.random.split(key)
    x = jax.random.normal(kx, (B, C_IN, L_IN), dtype=jnp.float32)

    torch_params = make_torch_params(kp)
    kernel_params = build_kernel_params(torch_params)

    out, l1, l2 = tiny_net_forward(x, kernel_params)
    jax.block_until_ready((out, l1, l2))

    # sanity: shapes + numerics vs pure-JAX reference.
    # tolerances account for bf16 matmul operands (accumulation stays f32).
    assert out.shape == (B, OUT)
    assert l1.shape == (B, CONV[0], L1P)
    assert l2.shape == (B, CONV[1], L2P)
    r_out, r_l1, r_l2 = ref_forward(x, torch_params)
    assert jnp.allclose(l1, r_l1, atol=3e-2, rtol=3e-2)
    assert jnp.allclose(l2, r_l2, atol=3e-2, rtol=3e-2)
    assert jnp.allclose(out, r_out, atol=3e-2, rtol=3e-2)

    print("KERNEL_OK")
</pallas_src>

<mosaic_0001>
module attributes {stable_mosaic.version = 11 : i64} {
  func.func @tiny_net_kernel(%arg0: memref<2x450xf32, #tpu.memory_space<vmem>>, %arg1: memref<450x1280xbf16, #tpu.memory_space<vmem>>, %arg2: memref<1x1280xf32, #tpu.memory_space<vmem>>, %arg3: memref<1x512xf32, #tpu.memory_space<vmem>>, %arg4: memref<1x256xf32, #tpu.memory_space<vmem>>, %arg5: memref<1x128xf32, #tpu.memory_space<vmem>>, %arg6: memref<1x128xf32, #tpu.memory_space<vmem>>, %arg7: memref<640x512xbf16, #tpu.memory_space<any>>, %arg8: memref<256x256xbf16, #tpu.memory_space<any>>, %arg9: memref<128x128xbf16, #tpu.memory_space<any>>, %arg10: memref<128x128xbf16, #tpu.memory_space<any>>, %arg11: memref<2x128xf32, #tpu.memory_space<vmem>>, %arg12: memref<2x640xf32, #tpu.memory_space<vmem>>, %arg13: memref<2x256xf32, #tpu.memory_space<vmem>>, %arg14: memref<640x512xbf16, #tpu.memory_space<vmem>>, %arg15: memref<256x256xbf16, #tpu.memory_space<vmem>>, %arg16: memref<128x128xbf16, #tpu.memory_space<vmem>>, %arg17: memref<128x128xbf16, #tpu.memory_space<vmem>>, %arg18: memref<4x!tpu.dma_semaphore, #tpu.memory_space<semaphore_mem>>) attributes {dimension_semantics = [], scalar_prefetch = 0 : i64, scratch_operands = 5 : i64, tpu.core_type = #tpu.core_type<tc>} {
    %c0_i32 = arith.constant 0 : i32
    %0 = tpu.memref_slice %arg18[%c0_i32] : memref<4x!tpu.dma_semaphore, #tpu.memory_space<semaphore_mem>> -> memref<1x!tpu.dma_semaphore, #tpu.memory_space<semaphore_mem>>
    %1 = tpu.memref_squeeze %0 : memref<1x!tpu.dma_semaphore, #tpu.memory_space<semaphore_mem>> -> memref<!tpu.dma_semaphore, #tpu.memory_space<semaphore_mem>>
    tpu.enqueue_dma source(%arg7 : memref<640x512xbf16, #tpu.memory_space<any>>) target(%arg14 : memref<640x512xbf16, #tpu.memory_space<vmem>>) target_semaphore(%1 : memref<!tpu.dma_semaphore, #tpu.memory_space<semaphore_mem>>)
    %c1_i32 = arith.constant 1 : i32
    %2 = tpu.memref_slice %arg18[%c1_i32] : memref<4x!tpu.dma_semaphore, #tpu.memory_space<semaphore_mem>> -> memref<1x!tpu.dma_semaphore, #tpu.memory_space<semaphore_mem>>
    %3 = tpu.memref_squeeze %2 : memref<1x!tpu.dma_semaphore, #tpu.memory_space<semaphore_mem>> -> memref<!tpu.dma_semaphore, #tpu.memory_space<semaphore_mem>>
    tpu.enqueue_dma source(%arg8 : memref<256x256xbf16, #tpu.memory_space<any>>) target(%arg15 : memref<256x256xbf16, #tpu.memory_space<vmem>>) target_semaphore(%3 : memref<!tpu.dma_semaphore, #tpu.memory_space<semaphore_mem>>)
    %c2_i32 = arith.constant 2 : i32
    %4 = tpu.memref_slice %arg18[%c2_i32] : memref<4x!tpu.dma_semaphore, #tpu.memory_space<semaphore_mem>> -> memref<1x!tpu.dma_semaphore, #tpu.memory_space<semaphore_mem>>
    %5 = tpu.memref_squeeze %4 : memref<1x!tpu.dma_semaphore, #tpu.memory_space<semaphore_mem>> -> memref<!tpu.dma_semaphore, #tpu.memory_space<semaphore_mem>>
    tpu.enqueue_dma source(%arg9 : memref<128x128xbf16, #tpu.memory_space<any>>) target(%arg16 : memref<128x128xbf16, #tpu.memory_space<vmem>>) target_semaphore(%5 : memref<!tpu.dma_semaphore, #tpu.memory_space<semaphore_mem>>)
    %c3_i32 = arith.constant 3 : i32
    %6 = tpu.memref_slice %arg18[%c3_i32] : memref<4x!tpu.dma_semaphore, #tpu.memory_space<semaphore_mem>> -> memref<1x!tpu.dma_semaphore, #tpu.memory_space<semaphore_mem>>
    %7 = tpu.memref_squeeze %6 : memref<1x!tpu.dma_semaphore, #tpu.memory_space<semaphore_mem>> -> memref<!tpu.dma_semaphore, #tpu.memory_space<semaphore_mem>>
    tpu.enqueue_dma source(%arg10 : memref<128x128xbf16, #tpu.memory_space<any>>) target(%arg17 : memref<128x128xbf16, #tpu.memory_space<vmem>>) target_semaphore(%7 : memref<!tpu.dma_semaphore, #tpu.memory_space<semaphore_mem>>)
    %c0 = arith.constant 0 : index
    %c0_0 = arith.constant 0 : index
    %8 = vector.load %arg0[%c0, %c0_0] : memref<2x450xf32, #tpu.memory_space<vmem>>, vector<2x450xf32>
    %9 = arith.truncf %8 : vector<2x450xf32> to vector<2x450xbf16>
    %c0_1 = arith.constant 0 : index
    %c0_2 = arith.constant 0 : index
    %10 = vector.load %arg1[%c0_1, %c0_2] : memref<450x1280xbf16, #tpu.memory_space<vmem>>, vector<450x1280xbf16>
    %cst = arith.constant dense<0.000000e+00> : vector<2x1280xf32>
    %11 = tpu.matmul %9, %10, %cst {dimension_numbers = #tpu.dot_dimension_numbers<[1], [0], [0], [1], [0, 0, 1, 1], [], []>} : vector<2x450xbf16>, vector<450x1280xbf16>, vector<2x1280xf32> -> vector<2x1280xf32>
    %c0_3 = arith.constant 0 : index
    %c0_4 = arith.constant 0 : index
    %12 = vector.load %arg2[%c0_3, %c0_4] : memref<1x1280xf32, #tpu.memory_space<vmem>>, vector<1x1280xf32>
    %13 = vector.broadcast %12 : vector<1x1280xf32> to vector<2x1280xf32>
    %14 = arith.addf %11, %13 : vector<2x1280xf32>
    %cst_5 = arith.constant 0.000000e+00 : f32
    %15 = vector.broadcast %cst_5 : f32 to vector<2x1280xf32>
    %16 = arith.maximumf %14, %15 : vector<2x1280xf32>
    %17 = vector.extract_strided_slice %16 {offsets = [0, 0], sizes = [2, 640], strides = [1, 1]} : vector<2x1280xf32> to vector<2x640xf32>
    %18 = vector.extract_strided_slice %16 {offsets = [0, 640], sizes = [2, 640], strides = [1, 1]} : vector<2x1280xf32> to vector<2x640xf32>
    %19 = arith.maximumf %17, %18 : vector<2x640xf32>
    %c0_6 = arith.constant 0 : index
    %c0_7 = arith.constant 0 : index
    %20 = vector.load %arg12[%c0_6, %c0_7] : memref<2x640xf32, #tpu.memory_space<vmem>>, vector<2x640xf32>
    tpu.vector_store %arg12[%c0_6, %c0_7], %19 {strides = array<i32>} : memref<2x640xf32, #tpu.memory_space<vmem>>, vector<2x640xf32>,
    %c0_i32_8 = arith.constant 0 : i32
    %21 = tpu.memref_slice %arg18[%c0_i32_8] : memref<4x!tpu.dma_semaphore, #tpu.memory_space<semaphore_mem>> -> memref<1x!tpu.dma_semaphore, #tpu.memory_space<semaphore_mem>>
    %22 = tpu.memref_squeeze %21 : memref<1x!tpu.dma_semaphore, #tpu.memory_space<semaphore_mem>> -> memref<!tpu.dma_semaphore, #tpu.memory_space<semaphore_mem>>
    tpu.wait_dma2 semaphore(%22 : memref<!tpu.dma_semaphore, #tpu.memory_space<semaphore_mem>>) src(%arg7 : memref<640x512xbf16, #tpu.memory_space<any>>) dst(%arg14 : memref<640x512xbf16, #tpu.memory_space<vmem>>)
    %23 = arith.truncf %19 : vector<2x640xf32> to vector<2x640xbf16>
    %c0_9 = arith.constant 0 : index
    %c0_10 = arith.constant 0 : index
    %24 = vector.load %arg14[%c0_9, %c0_10] : memref<640x512xbf16, #tpu.memory_space<vmem>>, vector<640x512xbf16>
    %cst_11 = arith.constant dense<0.000000e+00> : vector<2x512xf32>
    %25 = tpu.matmul %23, %24, %cst_11 {dimension_numbers = #tpu.dot_dimension_numbers<[1], [0], [0], [1], [0, 0, 1, 1], [], []>} : vector<2x640xbf16>, vector<640x512xbf16>, vector<2x512xf32> -> vector<2x512xf32>
    %c0_12 = arith.constant 0 : index
    %c0_13 = arith.constant 0 : index
    %26 = vector.load %arg3[%c0_12, %c0_13] : memref<1x512xf32, #tpu.memory_space<vmem>>, vector<1x512xf32>
    %27 = vector.broadcast %26 : vector<1x512xf32> to vector<2x512xf32>
    %28 = arith.addf %25, %27 : vector<2x512xf32>
    %cst_14 = arith.constant 0.000000e+00 : f32
    %29 = vector.broadcast %cst_14 : f32 to vector<2x512xf32>
    %30 = arith.maximumf %28, %29 : vector<2x512xf32>
    %31 = vector.extract_strided_slice %30 {offsets = [0, 0], sizes = [2, 256], strides = [1, 1]} : vector<2x512xf32> to vector<2x256xf32>
    %32 = vector.extract_strided_slice %30 {offsets = [0, 256], sizes = [2, 256], strides = [1, 1]} : vector<2x512xf32> to vector<2x256xf32>
    %33 = arith.maximumf %31, %32 : vector<2x256xf32>
    %c0_15 = arith.constant 0 : index
    %c0_16 = arith.constant 0 : index
    %34 = vector.load %arg13[%c0_15, %c0_16] : memref<2x256xf32, #tpu.memory_space<vmem>>, vector<2x256xf32>
    tpu.vector_store %arg13[%c0_15, %c0_16], %33 {strides = array<i32>} : memref<2x256xf32, #tpu.memory_space<vmem>>, vector<2x256xf32>,
    %c1_i32_17 = arith.constant 1 : i32
    %35 = tpu.memref_slice %arg18[%c1_i32_17] : memref<4x!tpu.dma_semaphore, #tpu.memory_space<semaphore_mem>> -> memref<1x!tpu.dma_semaphore, #tpu.memory_space<semaphore_mem>>
    %36 = tpu.memref_squeeze %35 : memref<1x!tpu.dma_semaphore, #tpu.memory_space<semaphore_mem>> -> memref<!tpu.dma_semaphore, #tpu.memory_space<semaphore_mem>>
    tpu.wait_dma2 semaphore(%36 : memref<!tpu.dma_semaphore, #tpu.memory_space<semaphore_mem>>) src(%arg8 : memref<256x256xbf16, #tpu.memory_space<any>>) dst(%arg15 : memref<256x256xbf16, #tpu.memory_space<vmem>>)
    %37 = arith.truncf %33 : vector<2x256xf32> to vector<2x256xbf16>
    %c0_18 = arith.constant 0 : index
    %c0_19 = arith.constant 0 : index
    %38 = vector.load %arg15[%c0_18, %c0_19] : memref<256x256xbf16, #tpu.memory_space<vmem>>, vector<256x256xbf16>
    %cst_20 = arith.constant dense<0.000000e+00> : vector<2x256xf32>
    %39 = tpu.matmul %37, %38, %cst_20 {dimension_numbers = #tpu.dot_dimension_numbers<[1], [0], [0], [1], [0, 0, 1, 1], [], []>} : vector<2x256xbf16>, vector<256x256xbf16>, vector<2x256xf32> -> vector<2x256xf32>
    %c0_21 = arith.constant 0 : index
    %c0_22 = arith.constant 0 : index
    %40 = vector.load %arg4[%c0_21, %c0_22] : memref<1x256xf32, #tpu.memory_space<vmem>>, vector<1x256xf32>
    %41 = vector.broadcast %40 : vector<1x256xf32> to vector<2x256xf32>
    %42 = arith.addf %39, %41 : vector<2x256xf32>
    %cst_23 = arith.constant 0.000000e+00 : f32
    %43 = vector.broadcast %cst_23 : f32 to vector<2x256xf32>
    %44 = arith.maximumf %42, %43 : vector<2x256xf32>
    %45 = vector.extract_strided_slice %44 {offsets = [0, 0], sizes = [2, 128], strides = [1, 1]} : vector<2x256xf32> to vector<2x128xf32>
    %46 = vector.extract_strided_slice %44 {offsets = [0, 128], sizes = [2, 128], strides = [1, 1]} : vector<2x256xf32> to vector<2x128xf32>
    %47 = arith.maximumf %45, %46 : vector<2x128xf32>
    %c2_i32_24 = arith.constant 2 : i32
    %48 = tpu.memref_slice %arg18[%c2_i32_24] : memref<4x!tpu.dma_semaphore, #tpu.memory_space<semaphore_mem>> -> memref<1x!tpu.dma_semaphore, #tpu.memory_space<semaphore_mem>>
    %49 = tpu.memref_squeeze %48 : memref<1x!tpu.dma_semaphore, #tpu.memory_space<semaphore_mem>> -> memref<!tpu.dma_semaphore, #tpu.memory_space<semaphore_mem>>
    tpu.wait_dma2 semaphore(%49 : memref<!tpu.dma_semaphore, #tpu.memory_space<semaphore_mem>>) src(%arg9 : memref<128x128xbf16, #tpu.memory_space<any>>) dst(%arg16 : memref<128x128xbf16, #tpu.memory_space<vmem>>)
    %50 = arith.truncf %47 : vector<2x128xf32> to vector<2x128xbf16>
    %c0_25 = arith.constant 0 : index
    %c0_26 = arith.constant 0 : index
    %51 = vector.load %arg16[%c0_25, %c0_26] : memref<128x128xbf16, #tpu.memory_space<vmem>>, vector<128x128xbf16>
    %cst_27 = arith.constant dense<0.000000e+00> : vector<2x128xf32>
    %52 = tpu.matmul %50, %51, %cst_27 {dimension_numbers = #tpu.dot_dimension_numbers<[1], [0], [0], [1], [0, 0, 1, 1], [], []>} : vector<2x128xbf16>, vector<128x128xbf16>, vector<2x128xf32> -> vector<2x128xf32>
    %c0_28 = arith.constant 0 : index
    %c0_29 = arith.constant 0 : index
    %53 = vector.load %arg5[%c0_28, %c0_29] : memref<1x128xf32, #tpu.memory_space<vmem>>, vector<1x128xf32>
    %54 = vector.broadcast %53 : vector<1x128xf32> to vector<2x128xf32>
    %55 = arith.addf %52, %54 : vector<2x128xf32>
    %cst_30 = arith.constant 0.000000e+00 : f32
    %56 = vector.broadcast %cst_30 : f32 to vector<2x128xf32>
    %57 = arith.maximumf %55, %56 : vector<2x128xf32>
    %c3_i32_31 = arith.constant 3 : i32
    %58 = tpu.memref_slice %arg18[%c3_i32_31] : memref<4x!tpu.dma_semaphore, #tpu.memory_space<semaphore_mem>> -> memref<1x!tpu.dma_semaphore, #tpu.memory_space<semaphore_mem>>
    %59 = tpu.memref_squeeze %58 : memref<1x!tpu.dma_semaphore, #tpu.memory_space<semaphore_mem>> -> memref<!tpu.dma_semaphore, #tpu.memory_space<semaphore_mem>>
    tpu.wait_dma2 semaphore(%59 : memref<!tpu.dma_semaphore, #tpu.memory_space<semaphore_mem>>) src(%arg10 : memref<128x128xbf16, #tpu.memory_space<any>>) dst(%arg17 : memref<128x128xbf16, #tpu.memory_space<vmem>>)
    %60 = arith.truncf %57 : vector<2x128xf32> to vector<2x128xbf16>
    %c0_32 = arith.constant 0 : index
    %c0_33 = arith.constant 0 : index
    %61 = vector.load %arg17[%c0_32, %c0_33] : memref<128x128xbf16, #tpu.memory_space<vmem>>, vector<128x128xbf16>
    %cst_34 = arith.constant dense<0.000000e+00> : vector<2x128xf32>
    %62 = tpu.matmul %60, %61, %cst_34 {dimension_numbers = #tpu.dot_dimension_numbers<[1], [0], [0], [1], [0, 0, 1, 1], [], []>} : vector<2x128xbf16>, vector<128x128xbf16>, vector<2x128xf32> -> vector<2x128xf32>
    %c0_35 = arith.constant 0 : index
    %c0_36 = arith.constant 0 : index
    %63 = vector.load %arg6[%c0_35, %c0_36] : memref<1x128xf32, #tpu.memory_space<vmem>>, vector<1x128xf32>
    %64 = vector.broadcast %63 : vector<1x128xf32> to vector<2x128xf32>
    %65 = arith.addf %62, %64 : vector<2x128xf32>
    %c0_37 = arith.constant 0 : index
    %c0_38 = arith.constant 0 : index
    %66 = vector.load %arg11[%c0_37, %c0_38] : memref<2x128xf32, #tpu.memory_space<vmem>>, vector<2x128xf32>
    tpu.vector_store %arg11[%c0_37, %c0_38], %65 {strides = array<i32>} : memref<2x128xf32, #tpu.memory_space<vmem>>, vector<2x128xf32>,
    return
  }
}

</mosaic_0001>

<bundles_post_ra>
// kernel: tpu_custom_call.1
= control target key start
LH: loop header
LB: loop body
LE: loop exit
PB: predicated region body
PF: predicated region fallthrough
CT: control target
= control target key end

     0   :  { %19 = vsyncpa [#allocation8], 0  ;;  %s4779_s0 = inlined_call_operand.hbm [shape: f32[2,450], index: 0, kind: input, shape index: {}]   ;;  %s4780_s1 = inlined_call_operand.hbm [shape: bf16[450,1280], index: 1, kind: input, shape index: {}]   ;;  %s4781_s2 = inlined_call_operand.hbm [shape: f32[1,1280], index: 2, kind: input, shape index: {}]   ;;  %s4782_s3 = inlined_call_operand.hbm [shape: f32[1,512], index: 3, kind: input, shape index: {}]   ;;  %s4783_s4 = inlined_call_operand.hbm [shape: f32[1,256], index: 4, kind: input, shape index: {}]   ;;  %s4784_s5 = inlined_call_operand.hbm [shape: f32[1,128], index: 5, kind: input, shape index: {}]   ;;  %s4785_s6 = inlined_call_operand.hbm [shape: f32[1,128], index: 6, kind: input, shape index: {}]   ;;  %s4786_s7 = inlined_call_operand.hbm [shape: bf16[640,512], index: 7, kind: input, shape index: {}]   ;;  %s4787_s8 = inlined_call_operand.hbm [shape: bf16[256,256], index: 8, kind: input, shape index: {}]   ;;  %s4788_s9 = inlined_call_operand.hbm [shape: bf16[128,128], index: 9, kind: input, shape index: {}]   ;;  %s4789_s10 = inlined_call_operand.hbm [shape: bf16[128,128], index: 10, kind: input, shape index: {}]   ;;  %s4790_s11 = inlined_call_operand.hbm [shape: f32[2,128], index: 11, kind: output, shape index: {0}]   ;;  %s4791_s12 = inlined_call_operand.hbm [shape: f32[2,640], index: 12, kind: output, shape index: {1}]   ;;  %s4792_s13 = inlined_call_operand.hbm [shape: f32[2,256], index: 13, kind: output, shape index: {2}]  }
   0x1   :  { %20 = vsyncpa [#allocation11], 0 }
   0x2   :  { %21 = vsyncpa [#allocation14], 0 }
   0x3   :  { %22 = vsyncpa [#allocation17], 0 }
   0x4   :  { %23 = vsyncpa [#allocation9], 0 }
   0x5   :  { %24 = vsyncpa [#allocation21], 0  ;;  %s4403_s25 = smov [#allocation10]   ;;  %s4119_s29 = scalar_lea.hbm %s4780_s1, 36480 }
   0x6   :  { %s40_s26 = sshll.u32 %s4403_s25, 4  ;;  %p4120_p0 = scmp.ne.s32.totalorder %s4780_s1, %s4119_s29  ;;  %s41_s26 = int_to_ptr.vmem [resolvable:$true] %s40_s26 }
   0x7   :  { %p4123_p1 = scmp.lt.u32.totalorder %s4119_s29, %s4780_s1 }
   0x9   :  { %p4125_p2 = pnand %p4123_p1, %p4120_p0 }
   0xb   :  { %4128 = shalt.err (!%p4125_p2)
}
   0xc   :  { %s4129_s17 = scalar_lea.vmem %s41_s26, 36480  ;;  %p4134_p4 = scmp.lt.s32.totalorder %s41_s26, %s41_s26 }
   0xd   :  { %p4130_p3 = scmp.ne.s32.totalorder %s41_s26, %s4129_s17  ;;  %p4135_p5 = scmp.lt.s32.totalorder %s4129_s17, %s4129_s17 }
   0xf   :  { %p4136_p6 = por %p4135_p5, %p4134_p4 }
  0x11   :  { %p4137_p7 = pnand %p4136_p6, %p4130_p3 }
  0x13   :  { %4140 = shalt.err (!%p4137_p7)
}
  0x14   :  { %s4404_s18 = smov 640   ;;  %s4405_s19 = smov 40  }
  0x15   :  { %46 = dma.hbm_to_vmem [thread:$0]  %s4780_s1, 36480, %s41_s26, [#allocation11], %s4404_s18, %s4404_s18, %s4405_s19  }
  0x16   :  { %s4406_s22 = smov [#allocation13]   ;;  %s4407_s24 = smov [#allocation16]  }
  0x17   :  { %s63_s23 = sshll.u32 %s4406_s22, 4  ;;  %s83_s25 = sshll.u32 %s4407_s24, 4  ;;  %s64_s23 = int_to_ptr.vmem [resolvable:$true] %s63_s23  ;;  %s84_s25 = int_to_ptr.vmem [resolvable:$true] %s83_s25 }
  0x18   :  { %s4141_s29 = scalar_lea.hbm %s4782_s3, 64 }
  0x19   :  { %p4142_p8 = scmp.ne.s32.totalorder %s4782_s3, %s4141_s29  ;;  %p4145_p9 = scmp.lt.u32.totalorder %s4141_s29, %s4782_s3 }
  0x1b   :  { %p4147_p10 = pnand %p4145_p9, %p4142_p8 }
  0x1d   :  { %4150 = shalt.err (!%p4147_p10)
}
  0x1e   :  { %s4151_s1 = scalar_lea.vmem %s64_s23, 64  ;;  %p4156_p12 = scmp.lt.s32.totalorder %s64_s23, %s64_s23 }
  0x1f   :  { %p4152_p11 = scmp.ne.s32.totalorder %s64_s23, %s4151_s1  ;;  %p4157_p13 = scmp.lt.s32.totalorder %s4151_s1, %s4151_s1 }
  0x21   :  { %p4158_p0 = por %p4157_p13, %p4156_p12 }
  0x23   :  { %p4159_p1 = pnand %p4158_p0, %p4152_p11 }
  0x25   :  { %4162 = shalt.err (!%p4159_p1)
}
  0x26   :  { %66 = dma.hbm_to_vmem [thread:$0]  %s4782_s3, 64, %s64_s23, [#allocation14]  }
  0x27   :  { %s4163_s20 = scalar_lea.hbm %s4784_s5, 16 }
  0x28   :  { %p4164_p2 = scmp.ne.s32.totalorder %s4784_s5, %s4163_s20  ;;  %p4167_p3 = scmp.lt.u32.totalorder %s4163_s20, %s4784_s5 }
  0x2a   :  { %p4169_p4 = pnand %p4167_p3, %p4164_p2 }
  0x2c   :  { %4172 = shalt.err (!%p4169_p4)
}
  0x2d   :  { %s4173_s28 = scalar_lea.vmem %s84_s25, 16  ;;  %s4177_s29 = scalar_lea.vmem %s84_s25, 32 }
  0x2e   :  { %p4174_p5 = scmp.ne.s32.totalorder %s84_s25, %s4173_s28  ;;  %p4178_p6 = scmp.lt.s32.totalorder %s84_s25, %s84_s25 }
  0x2f   :  { %p4179_p7 = scmp.lt.s32.totalorder %s4177_s29, %s4173_s28 }
  0x31   :  { %p4180_p8 = por %p4179_p7, %p4178_p6 }
  0x33   :  { %p4181_p9 = pnand %p4180_p8, %p4174_p5 }
  0x35   :  { %4184 = shalt.err (!%p4181_p9)
}
  0x36   :  { %86 = dma.hbm_to_vmem [thread:$0]  %s4784_s5, 16, %s84_s25, [#allocation17]  }
  0x37   :  { %s4408_s30 = smov [#allocation7]   ;;  %s4409_s15 = smov [#allocation12]  }
  0x38   :  { %s31_s14 = sshll.u32 %s4408_s30, 4  ;;  %s53_s16 = sshll.u32 %s4409_s15, 4  ;;  %s32_s14 = int_to_ptr.vmem [resolvable:$true] %s31_s14  ;;  %s54_s16 = int_to_ptr.vmem [resolvable:$true] %s53_s16 }
  0x39   :  { %s4185_s17 = scalar_lea.hbm %s4779_s0, 128 }
  0x3a   :  { %p4186_p10 = scmp.ne.s32.totalorder %s4779_s0, %s4185_s17  ;;  %p4189_p11 = scmp.lt.u32.totalorder %s4185_s17, %s4779_s0 }
  0x3c   :  { %p4191_p12 = pnand %p4189_p11, %p4186_p10 }
  0x3e   :  { %4194 = shalt.err (!%p4191_p12)
}
  0x3f   :  { %s4195_s5 = scalar_lea.vmem %s32_s14, 128  ;;  %p4200_p0 = scmp.lt.s32.totalorder %s32_s14, %s32_s14 }
  0x40   :  { %p4196_p13 = scmp.ne.s32.totalorder %s32_s14, %s4195_s5  ;;  %p4201_p1 = scmp.lt.s32.totalorder %s4195_s5, %s4195_s5 }
  0x42   :  { %p4202_p2 = por %p4201_p1, %p4200_p0 }
  0x44   :  { %p4203_p3 = pnand %p4202_p2, %p4196_p13 }
  0x46   :  { %4206 = shalt.err (!%p4203_p3)
}
  0x47   :  { %34 = dma.hbm_to_vmem [thread:$0]  %s4779_s0, 128, %s32_s14, [#allocation8]  }
  0x48   :  { %s4207_s28 = scalar_lea.hbm %s4781_s2, 160 }
  0x49   :  { %p4208_p4 = scmp.ne.s32.totalorder %s4781_s2, %s4207_s28  ;;  %p4211_p5 = scmp.lt.u32.totalorder %s4207_s28, %s4781_s2 }
  0x4b   :  { %p4213_p6 = pnand %p4211_p5, %p4208_p4 }
  0x4d   :  { %4216 = shalt.err (!%p4213_p6)
}
  0x4e   :  { %s4217_s15 = scalar_lea.vmem %s54_s16, 160  ;;  %p4222_p8 = scmp.lt.s32.totalorder %s54_s16, %s54_s16 }
  0x4f   :  { %p4218_p7 = scmp.ne.s32.totalorder %s54_s16, %s4217_s15  ;;  %p4223_p9 = scmp.lt.s32.totalorder %s4217_s15, %s4217_s15 }
  0x51   :  { %p4224_p10 = por %p4223_p9, %p4222_p8 }
  0x53   :  { %p4225_p11 = pnand %p4224_p10, %p4218_p7 }
  0x55   :  { %4228 = shalt.err (!%p4225_p11)
}
  0x56   :  { %56 = dma.hbm_to_vmem [thread:$0]  %s4781_s2, 160, %s54_s16, [#allocation11]  }
  0x57   :  { %s4410_s1 = smov [#allocation15]   ;;  %s4411_s17 = smov [#allocation18]  }
  0x58   :  { %s73_s26 = sshll.u32 %s4410_s1, 4  ;;  %s93_s18 = sshll.u32 %s4411_s17, 4  ;;  %s74_s26 = int_to_ptr.vmem [resolvable:$true] %s73_s26  ;;  %s94_s18 = int_to_ptr.vmem [resolvable:$true] %s93_s18 }
  0x59   :  { %s4229_s21 = scalar_lea.hbm %s4783_s4, 32 }
  0x5a   :  { %p4230_p12 = scmp.ne.s32.totalorder %s4783_s4, %s4229_s21  ;;  %p4233_p13 = scmp.lt.u32.totalorder %s4229_s21, %s4783_s4 }
  0x5c   :  { %p4235_p0 = pnand %p4233_p13, %p4230_p12 }
  0x5e   :  { %4238 = shalt.err (!%p4235_p0)
}
  0x5f   :  { %s4239_s2 = scalar_lea.vmem %s74_s26, 32  ;;  %p4244_p2 = scmp.lt.s32.totalorder %s74_s26, %s74_s26 }
  0x60   :  { %p4240_p1 = scmp.ne.s32.totalorder %s74_s26, %s4239_s2  ;;  %p4245_p3 = scmp.lt.s32.totalorder %s4239_s2, %s4239_s2 }
  0x62   :  { %p4246_p4 = por %p4245_p3, %p4244_p2 }
  0x64   :  { %p4247_p5 = pnand %p4246_p4, %p4240_p1 }
  0x66   :  { %4250 = shalt.err (!%p4247_p5)
}
  0x67   :  { %76 = dma.hbm_to_vmem [thread:$0]  %s4783_s4, 32, %s74_s26, [#allocation14]  }
  0x68   :  { %s4251_s3 = scalar_lea.hbm %s4785_s6, 16 }
  0x69   :  { %p4252_p6 = scmp.ne.s32.totalorder %s4785_s6, %s4251_s3  ;;  %p4255_p7 = scmp.lt.u32.totalorder %s4251_s3, %s4785_s6 }
  0x6b   :  { %p4257_p8 = pnand %p4255_p7, %p4252_p6 }
  0x6d   :  { %4260 = shalt.err (!%p4257_p8)
}
  0x6e   :  { %s4261_s14 = scalar_lea.vmem %s94_s18, 16  ;;  %s4265_s1 = scalar_lea.vmem %s94_s18, 32 }
  0x6f   :  { %p4262_p9 = scmp.ne.s32.totalorder %s94_s18, %s4261_s14  ;;  %p4266_p10 = scmp.lt.s32.totalorder %s94_s18, %s94_s18 }
  0x70   :  { %p4267_p11 = scmp.lt.s32.totalorder %s4265_s1, %s4261_s14 }
  0x72   :  { %p4268_p12 = por %p4267_p11, %p4266_p10 }
  0x74   :  { %p4269_p13 = pnand %p4268_p12, %p4262_p9 }
  0x76   :  { %4272 = shalt.err (!%p4269_p13)
}
  0x77   :  { %96 = dma.hbm_to_vmem [thread:$0]  %s4785_s6, 16, %s94_s18, [#allocation17]  }
  0x78   :  { %4383 = dma.done.wait [#allocation8], 128  }
  0x79   :  { %4384 = vsyncadd [#allocation8], 4294967168 }
  0x7a   :  { %4385 = dma.done.wait [#allocation11], 36640  }
  0x7b   :  { %4386 = vsyncadd [#allocation11], 4294930656 }
  0x7c   :  { %4387 = dma.done.wait [#allocation14], 96  }
  0x7d   :  { %4388 = vsyncadd [#allocation14], 4294967200 }
  0x7e   :  { %4389 = dma.done.wait [#allocation17], 32  }
  0x7f   :  { %4390 = vsyncadd [#allocation17], 4294967264  ;;  %s123_s17 = sld [smem:[#allocation0]]   ;;  %s4412_s19 = smov 512   ;;  %v4424_v36 = vmov 1983009808   ;;  %v219_v38 = vlaneseq }
  0x80   :  { %135 = sst [smem:[#allocation24]] %s4412_s19  ;;  %s4413_s20 = smov [#allocation2]   ;;  %v217_v37 = vunpack.c.l.s4 %v4424_v36  ;;  %vm2004_vm0 = vcmask 539648   ;;  %vm2008_vm1 = vcmask 1040384  }
  0x81   :  { %137 = sst [smem:[#allocation24 + $0x1]] %s4412_s19  ;;  %s131_s21 = sshll.u32 %s4413_s20, 4  ;;  %v4593_v43 = vshrl.u32 %v219_v38, 7  ;;  %s132_s21 = int_to_ptr.vmem [resolvable:$true] %s131_s21 }
  0x82   :  { %s4414_s5 = smov 4   ;;  %s4415_s25 = smov 64   ;;  %v218_v42 = vunpack.c.0.s8 %v217_v37 }
  0x83   :  { %139 = sst [smem:[#allocation24 + $0x2]] %s4414_s5  ;;  %s4416_s6 = smov 128  }
  0x84   :  { %141 = sst [smem:[#allocation24 + $0x3]] %s4415_s25  ;;  %s4417_s22 = smov 2   ;;  %v4596_v49 = vsub.s32 %v218_v42, %v4593_v43 }
  0x85   :  { %143 = sst [smem:[#allocation24 + $0x4]] %s4416_s6  ;;  %s3238_s18 = sshll.u32 %s123_s17, 26 }
  0x86   :  { %145 = sst [smem:[#allocation24 + $0x5]] %s4417_s22  ;;  %s3239_s24 = sadd.s32 134217728, %s3238_s18 }
  0x87   :  { %s4418_s2 = smov 256   ;;  %149 = sst [smem:[#allocation24 + $0x7]] %s4415_s25 }
  0x88   :  { %147 = sst [smem:[#allocation24 + $0x6]] %s4418_s2  ;;  %s4419_s16 = smov [#allocation6]  }
  0x89   :  { %151 = sst [smem:[#allocation24 + $0x8]] %s4414_s5  ;;  %s4420_s27 = smov [#allocation23]  }
  0x8a   :  { %153 = dma.general %s4786_s7, 20480, %s132_s21, %s4419_s16, %s4420_s27, [#allocation24], %s3239_s24, 0  }
  0x8b   :  { %170 = sst [smem:[#allocation26]] %s4418_s2  ;;  %s4421_s3 = smov [#allocation3]  }
  0x8c   :  { %172 = sst [smem:[#allocation26 + $0x1]] %s4418_s2  ;;  %s166_s23 = sshll.u32 %s4421_s3, 4  ;;  %s167_s23 = int_to_ptr.vmem [resolvable:$true] %s166_s23 }
  0x8d   :  { %174 = sst [smem:[#allocation26 + $0x2]] %s4417_s22  ;;  %s4422_s30 = smov [#allocation6 + $0x1]  }
  0x8e   :  { %176 = sst [smem:[#allocation26 + $0x3]] %s4415_s25  ;;  %s4423_s15 = smov [#allocation25]  }
  0x8f   :  { %178 = sst [smem:[#allocation26 + $0x4]] %s4416_s6  ;;  %s4425_s7 = smov [#allocation4]  }
  0x90   :  { %180 = sst [smem:[#allocation26 + $0x5]] %s4417_s22  ;;  %s4426_s1 = smov [#allocation5]  }
  0x91   :  { %182 = sst [smem:[#allocation26 + $0x6]] %s4416_s6  ;;  %s209_s4 = sshll.u32 %s4426_s1, 4  ;;  %s210_s4 = int_to_ptr.vmem [resolvable:$true] %s209_s4 }
  0x92   :  { %184 = sst [smem:[#allocation26 + $0x7]] %s4415_s25  ;;  %s4273_s19 = scalar_lea.hbm %s4788_s9, 1024 }
  0x93   :  { %186 = sst [smem:[#allocation26 + $0x8]] %s4414_s5  ;;  %p4274_p0 = scmp.ne.s32.totalorder %s4788_s9, %s4273_s19 }
  0x94   :  { %188 = dma.general %s4787_s8, 4096, %s167_s23, %s4422_s30, %s4423_s15, [#allocation26], %s3239_s24, 0  }
  0x95   :  { %v3688_v0 = vld [vmem:[#allocation10 + $0x4] ss:$40 sps:$4 sm:$0xff]   ;;  %v3692_v2 = vld [vmem:[#allocation10] ss:$40 sps:$4 sm:$0xff]   ;;  %v3694_v4 = vld [vmem:[#allocation10 + $0x54] ss:$40 sps:$4 sm:$0xff]   ;;  %p4277_p1 = scmp.lt.u32.totalorder %s4273_s19, %s4788_s9 }
  0x96   :  { %v3690_v1 = vld [vmem:[#allocation10 + $0xc] ss:$40 sps:$4 sm:$0xff]   ;;  %2039 = vmatprep.subr.bf16.mxu0 %v3688_v0  ;;  %v3693_v3 = vld [vmem:[#allocation10 + $0x8] ss:$40 sps:$4 sm:$0xff]   ;;  %v3696_v5 = vld [vmem:[#allocation10 + $0x5c] ss:$40 sps:$4 sm:$0xff]  }
  0x97   :  { %2121 = vmatprep.subr.bf16.mxu1 %v3690_v1  ;;  %2040 = vmatpush1.bf16.msra.mxu0 %v3692_v2  ;;  %v3698_v6 = vld [vmem:[#allocation10 + $0x50] ss:$40 sps:$4 sm:$0xff]   ;;  %v3700_v8 = vld [vmem:[#allocation10 + $0xa4] ss:$40 sps:$4 sm:$0xff]   ;;  %v3704_v10 = vld [vmem:[#allocation10 + $0xa0] ss:$40 sps:$4 sm:$0xff]   ;;  %p4279_p2 = pnand %p4277_p1, %p4274_p0 }
  0x98   :  { %2122 = vmatpush1.bf16.msra.mxu1 %v3693_v3  ;;  %2041 = vmatprep.subr.bf16.mxu0 %v3694_v4  ;;  %v3699_v7 = vld [vmem:[#allocation10 + $0x58] ss:$40 sps:$4 sm:$0xff]   ;;  %v3702_v9 = vld [vmem:[#allocation10 + $0xac] ss:$40 sps:$4 sm:$0xff]   ;;  %v3705_v11 = vld [vmem:[#allocation10 + $0xa8] ss:$40 sps:$4 sm:$0xff]  }
  0x99   :  { %2123 = vmatprep.subr.bf16.mxu1 %v3696_v5  ;;  %v3706_v12 = vld [vmem:[#allocation10 + $0xf4] ss:$40 sps:$4 sm:$0xff]   ;;  %v3710_v14 = vld [vmem:[#allocation10 + $0xf0] ss:$40 sps:$4 sm:$0xff]   ;;  %v3712_v16 = vld [vmem:[#allocation10 + $0x144] ss:$40 sps:$4 sm:$0xff]  }
  0x9a   :  { %v3708_v13 = vld [vmem:[#allocation10 + $0xfc] ss:$40 sps:$4 sm:$0xff]   ;;  %v3711_v15 = vld [vmem:[#allocation10 + $0xf8] ss:$40 sps:$4 sm:$0xff]   ;;  %v3714_v17 = vld [vmem:[#allocation10 + $0x14c] ss:$40 sps:$4 sm:$0xff]  }
  0x9b   :  { %2042 = vmatpush1.bf16.msra.mxu0 %v3698_v6  ;;  %v3716_v18 = vld [vmem:[#allocation10 + $0x140] ss:$40 sps:$4 sm:$0xff]   ;;  %v3718_v20 = vld [vmem:[#allocation10 + $0x194] ss:$40 sps:$4 sm:$0xff]   ;;  %v3722_v22 = vld [vmem:[#allocation10 + $0x190] ss:$40 sps:$4 sm:$0xff]  }
  0x9c   :  { %2124 = vmatpush1.bf16.msra.mxu1 %v3699_v7  ;;  %2043 = vmatprep.subr.bf16.mxu0 %v3700_v8  ;;  %v3717_v19 = vld [vmem:[#allocation10 + $0x148] ss:$40 sps:$4 sm:$0xff]   ;;  %v3720_v21 = vld [vmem:[#allocation10 + $0x19c] ss:$40 sps:$4 sm:$0xff]   ;;  %v3723_v23 = vld [vmem:[#allocation10 + $0x198] ss:$40 sps:$4 sm:$0xff]  }
  0x9d   :  { %2125 = vmatprep.subr.bf16.mxu1 %v3702_v9  ;;  %v3724_v24 = vld [vmem:[#allocation10 + $0x1e4] ss:$40 sps:$4 sm:$0xff]   ;;  %v3728_v26 = vld [vmem:[#allocation10 + $0x1e0] ss:$40 sps:$4 sm:$0xff]   ;;  %v3730_v28 = vld [vmem:[#allocation10 + $0x234] ss:$40 sps:$4 sm:$0xff]  }
  0x9e   :  { %v3726_v25 = vld [vmem:[#allocation10 + $0x1ec] ss:$40 sps:$4 sm:$0xff]   ;;  %v3729_v27 = vld [vmem:[#allocation10 + $0x1e8] ss:$40 sps:$4 sm:$0xff]   ;;  %v3732_v29 = vld [vmem:[#allocation10 + $0x23c] ss:$40 sps:$4 sm:$0xff]  }
  0x9f   :  { %2044 = vmatpush1.bf16.msra.mxu0 %v3704_v10  ;;  %v3734_v30 = vld [vmem:[#allocation10 + $0x230] ss:$40 sps:$4 sm:$0xff]   ;;  %v3736_v32 = vld [vmem:[#allocation10 + $0x284] ss:$40 sps:$4 sm:$0xff]   ;;  %v3740_v34 = vld [vmem:[#allocation10 + $0x280] ss:$40 sps:$4 sm:$0xff]  }
  0xa0   :  { %2126 = vmatpush1.bf16.msra.mxu1 %v3705_v11  ;;  %2045 = vmatprep.subr.bf16.mxu0 %v3706_v12  ;;  %v3735_v31 = vld [vmem:[#allocation10 + $0x238] ss:$40 sps:$4 sm:$0xff]   ;;  %v3738_v33 = vld [vmem:[#allocation10 + $0x28c] ss:$40 sps:$4 sm:$0xff]   ;;  %v3741_v35 = vld [vmem:[#allocation10 + $0x288] ss:$40 sps:$4 sm:$0xff]  }
  0xa1   :  { %2127 = vmatprep.subr.bf16.mxu1 %v3708_v13  ;;  %v3742_v39 = vld [vmem:[#allocation10 + $0x2d4] ss:$40 sps:$4 sm:$0xff]   ;;  %v3746_v41 = vld [vmem:[#allocation10 + $0x2d0] ss:$40 sps:$4 sm:$0xff]   ;;  %v3748_v45 = vld [vmem:[#allocation10 + $0x324] ss:$40 sps:$4 sm:$0xff]  }
  0xa2   :  { %v3744_v40 = vld [vmem:[#allocation10 + $0x2dc] ss:$40 sps:$4 sm:$0xff]   ;;  %v3747_v44 = vld [vmem:[#allocation10 + $0x2d8] ss:$40 sps:$4 sm:$0xff]   ;;  %v3750_v46 = vld [vmem:[#allocation10 + $0x32c] ss:$40 sps:$4 sm:$0xff]  }
  0xa3   :  { %2046 = vmatpush1.bf16.msra.mxu0 %v3710_v14  ;;  %v3752_v47 = vld [vmem:[#allocation10 + $0x320] ss:$40 sps:$4 sm:$0xff]   ;;  %v3754_v50 = vld [vmem:[#allocation10 + $0x374] ss:$40 sps:$4 sm:$0xff]   ;;  %v3758_v53 = vld [vmem:[#allocation10 + $0x370] ss:$40 sps:$4 sm:$0xff]  }
  0xa4   :  { %2128 = vmatpush1.bf16.msra.mxu1 %v3711_v15  ;;  %2047 = vmatprep.subr.bf16.mxu0 %v3712_v16  ;;  %v3753_v48 = vld [vmem:[#allocation10 + $0x328] ss:$40 sps:$4 sm:$0xff]   ;;  %v3756_v51 = vld [vmem:[#allocation10 + $0x37c] ss:$40 sps:$4 sm:$0xff]   ;;  %v3759_v55 = vld [vmem:[#allocation10 + $0x378] ss:$40 sps:$4 sm:$0xff]  }
  0xa5   :  { %2129 = vmatprep.subr.bf16.mxu1 %v3714_v17  ;;  %v213_v52 = vld [vmem:[#allocation7] sm:$0xff]  ;;  %v3760_v56 = vld [vmem:[#allocation10 + $0x3c4] ss:$40 sps:$4 sm:$0xff]   ;;  %v3764_v59 = vld [vmem:[#allocation10 + $0x3c0] ss:$40 sps:$4 sm:$0xff]   ;;  %s197_s8 = sshll.u32 %s4425_s7, 4  ;;  %s198_s8 = int_to_ptr.vmem [resolvable:$true] %s197_s8 }
  0xa6   :  { %v222_v54 = vrot.slane %v213_v52, %v4596_v49  ;;  %v3762_v57 = vld [vmem:[#allocation10 + $0x3cc] ss:$40 sps:$4 sm:$0xff]   ;;  %v3765_v61 = vld [vmem:[#allocation10 + $0x3c8] ss:$40 sps:$4 sm:$0xff]   ;;  %v3768_v63 = vld [vmem:[#allocation10 + $0x41c] ss:$40 sps:$4 sm:$0xff]   ;;  %v215_v4 = vcombine.high %v213_v52, %v213_v52 }
  0xa7   :  { %2048 = vmatpush1.bf16.msra.mxu0 %v3716_v18  ;;  %v3766_v62 = vld [vmem:[#allocation10 + $0x414] ss:$40 sps:$4 sm:$0xff]   ;;  %v3770_v0 = vld [vmem:[#allocation10 + $0x410] ss:$40 sps:$4 sm:$0xff]   ;;  %v3772_v2 = vld [vmem:[#allocation10 + $0x464] ss:$40 sps:$4 sm:$0xff]  }
  0xa8   :  { %2130 = vmatpush1.bf16.msra.mxu1 %v3717_v19  ;;  %2049 = vmatprep.subr.bf16.mxu0 %v3718_v20  ;;  %v230_v58 = vcombine.high %v222_v54, %v222_v54  ;;  %v3771_v1 = vld [vmem:[#allocation10 + $0x418] ss:$40 sps:$4 sm:$0xff]   ;;  %v3774_v3 = vld [vmem:[#allocation10 + $0x46c] ss:$40 sps:$4 sm:$0xff]   ;;  %v3777_v6 = vld [vmem:[#allocation10 + $0x468] ss:$40 sps:$4 sm:$0xff]   ;;  %v4604_v9 = vrot.slane %v215_v4, %v4596_v49  ;;  %v4608_v16 = vpack.c.bf16 %v222_v54, %v222_v54 }
  0xa9   :  { %2131 = vmatprep.subr.bf16.mxu1 %v3720_v21  ;;  %v3776_v5 = vld [vmem:[#allocation10 + $0x460] ss:$40 sps:$4 sm:$0xff]   ;;  %v3778_v7 = vld [vmem:[#allocation10 + $0x4b4] ss:$40 sps:$4 sm:$0xff]   ;;  %v3782_v10 = vld [vmem:[#allocation10 + $0x4b0] ss:$40 sps:$4 sm:$0xff]  }
  0xaa   :  { %v4599_v60 = vpack.c.bf16 %v230_v58, %v230_v58  ;;  %v3780_v8 = vld [vmem:[#allocation10 + $0x4bc] ss:$40 sps:$4 sm:$0xff]   ;;  %v3783_v11 = vld [vmem:[#allocation10 + $0x4b8] ss:$40 sps:$4 sm:$0xff]   ;;  %v3789_v13 = vld [vmem:[#allocation10 + $0x50c] ss:$40 sps:$4 sm:$0xff]   ;;  %v231_v14 = vcombine.high %v4604_v9, %v4604_v9 }
  0xab   :  { %2050 = vmatpush1.bf16.msra.mxu0 %v3722_v22  ;;  %v3786_v12 = vld [vmem:[#allocation10 + $0x504] ss:$40 sps:$4 sm:$0xff]   ;;  %v3784_v15 = vld [vmem:[#allocation10 + $0x500] ss:$40 sps:$4 sm:$0xff]   ;;  %v3792_v18 = vld [vmem:[#allocation10 + $0x554] ss:$40 sps:$4 sm:$0xff]  }
  0xac   :  { %2132 = vmatpush1.bf16.msra.mxu1 %v3723_v23  ;;  %2051 = vmatprep.subr.bf16.mxu0 %v3724_v24  ;;  %v3787_v17 = vld [vmem:[#allocation10 + $0x508] ss:$40 sps:$4 sm:$0xff]   ;;  %v3795_v19 = vld [vmem:[#allocation10 + $0x55c] ss:$40 sps:$4 sm:$0xff]   ;;  %v4610_v20 = vpack.c.bf16 %v231_v14, %v231_v14  ;;  %v3793_v22 = vld [vmem:[#allocation10 + $0x558] ss:$40 sps:$4 sm:$0xff]  }
  0xad   :  { %2133 = vmatprep.subr.bf16.mxu1 %v3726_v25  ;;  %2071 = vmatprep.mubr.bf16.mxu0 %v4599_v60  ;;  %v3790_v21 = vld [vmem:[#allocation10 + $0x550] ss:$40 sps:$4 sm:$0xff]   ;;  %v3798_v23 = vld [vmem:[#allocation10 + $0x5a4] ss:$40 sps:$4 sm:$0xff]   ;;  %v3796_v25 = vld [vmem:[#allocation10 + $0x5a0] ss:$40 sps:$4 sm:$0xff]  }
  0xae   :  { %2153 = vmatprep.mubr.bf16.mxu1 %v4599_v60  ;;  %v3801_v24 = vld [vmem:[#allocation10 + $0x5ac] ss:$40 sps:$4 sm:$0xff]   ;;  %v3819_v36 = vld [vmem:[#allocation10 + $0x69c] ss:$40 sps:$4 sm:$0xff]   ;;  %v3814_v37 = vld [vmem:[#allocation10 + $0x690] ss:$40 sps:$4 sm:$0xff]  }
  0xaf   :  { %2052 = vmatpush1.bf16.msra.mxu0 %v3728_v26  ;;  %v3799_v26 = vld [vmem:[#allocation10 + $0x5a8] ss:$40 sps:$4 sm:$0xff]   ;;  %v3817_v38 = vld [vmem:[#allocation10 + $0x698] ss:$40 sps:$4 sm:$0xff]   ;;  %v3843_v54 = vld [vmem:[#allocation10 + $0x7dc] ss:$40 sps:$4 sm:$0xff]  }
  0xb0   :  { %2134 = vmatpush1.bf16.msra.mxu1 %v3729_v27  ;;  %2053 = vmatprep.subr.bf16.mxu0 %v3730_v28  ;;  %v3804_v27 = vld [vmem:[#allocation10 + $0x5f4] ss:$40 sps:$4 sm:$0xff]   ;;  %v3823_v42 = vld [vmem:[#allocation10 + $0x6e8] ss:$40 sps:$4 sm:$0xff]  }
  0xb1   :  { %2135 = vmatprep.subr.bf16.mxu1 %v3732_v29  ;;  %v3807_v28 = vld [vmem:[#allocation10 + $0x5fc] ss:$40 sps:$4 sm:$0xff]   ;;  %v3802_v29 = vld [vmem:[#allocation10 + $0x5f0] ss:$40 sps:$4 sm:$0xff]   ;;  %v3849_v58 = vld [vmem:[#allocation10 + $0x82c] ss:$40 sps:$4 sm:$0xff]  }
  0xb2   :  { %v3835_v52 = vld [vmem:[#allocation10 + $0x788] ss:$40 sps:$4 sm:$0xff]  }
  0xb3   :  { %2054 = vmatpush1.bf16.msra.mxu0 %v3734_v30  ;;  %v3805_v30 = vld [vmem:[#allocation10 + $0x5f8] ss:$40 sps:$4 sm:$0xff]  }
  0xb4   :  { %2136 = vmatpush1.bf16.msra.mxu1 %v3735_v31  ;;  %2055 = vmatprep.subr.bf16.mxu0 %v3736_v32  ;;  %v3810_v31 = vld [vmem:[#allocation10 + $0x644] ss:$40 sps:$4 sm:$0xff]   ;;  %v3861_v14 = vld [vmem:[#allocation10 + $0x10] ss:$40 sps:$4 sm:$0xff]  }
  0xb5   :  { %2137 = vmatprep.subr.bf16.mxu1 %v3738_v33  ;;  %v3813_v32 = vld [vmem:[#allocation10 + $0x64c] ss:$40 sps:$4 sm:$0xff]   ;;  %v3808_v33 = vld [vmem:[#allocation10 + $0x640] ss:$40 sps:$4 sm:$0xff]  }
  0xb7   :  { %2056 = vmatpush1.bf16.msra.mxu0 %v3740_v34  ;;  %v3811_v34 = vld [vmem:[#allocation10 + $0x648] ss:$40 sps:$4 sm:$0xff]  }
  0xb8   :  { %2138 = vmatpush1.bf16.msra.mxu1 %v3741_v35  ;;  %2057 = vmatprep.subr.bf16.mxu0 %v3742_v39  ;;  %v3816_v35 = vld [vmem:[#allocation10 + $0x694] ss:$40 sps:$4 sm:$0xff]   ;;  %v3822_v39 = vld [vmem:[#allocation10 + $0x6e4] ss:$40 sps:$4 sm:$0xff]  }
  0xb9   :  { %2139 = vmatprep.subr.bf16.mxu1 %v3744_v40  ;;  %v3825_v40 = vld [vmem:[#allocation10 + $0x6ec] ss:$40 sps:$4 sm:$0xff]  }
  0xbb   :  { %2058 = vmatpush1.bf16.msra.mxu0 %v3746_v41  ;;  %v3820_v41 = vld [vmem:[#allocation10 + $0x6e0] ss:$40 sps:$4 sm:$0xff]  }
  0xbc   :  { %2140 = vmatpush1.bf16.msra.mxu1 %v3747_v44  ;;  %2059 = vmatprep.subr.bf16.mxu0 %v3748_v45  ;;  %v3828_v44 = vld [vmem:[#allocation10 + $0x734] ss:$40 sps:$4 sm:$0xff]  }
  0xbd   :  { %2141 = vmatprep.subr.bf16.mxu1 %v3750_v46  ;;  %v3831_v45 = vld [vmem:[#allocation10 + $0x73c] ss:$40 sps:$4 sm:$0xff]   ;;  %v3826_v46 = vld [vmem:[#allocation10 + $0x730] ss:$40 sps:$4 sm:$0xff]  }
  0xbf   :  { %2060 = vmatpush1.bf16.msra.mxu0 %v3752_v47  ;;  %v3829_v47 = vld [vmem:[#allocation10 + $0x738] ss:$40 sps:$4 sm:$0xff]  }
  0xc0   :  { %2142 = vmatpush1.bf16.msra.mxu1 %v3753_v48  ;;  %2061 = vmatprep.subr.bf16.mxu0 %v3754_v50  ;;  %v3834_v48 = vld [vmem:[#allocation10 + $0x784] ss:$40 sps:$4 sm:$0xff]  }
  0xc1   :  { %2143 = vmatprep.subr.bf16.mxu1 %v3756_v51  ;;  %v3837_v50 = vld [vmem:[#allocation10 + $0x78c] ss:$40 sps:$4 sm:$0xff]   ;;  %v3832_v51 = vld [vmem:[#allocation10 + $0x780] ss:$40 sps:$4 sm:$0xff]  }
  0xc3   :  { %2062 = vmatpush1.bf16.msra.mxu0 %v3758_v53  ;;  %v3840_v53 = vld [vmem:[#allocation10 + $0x7d4] ss:$40 sps:$4 sm:$0xff]  }
  0xc4   :  { %2144 = vmatpush1.bf16.msra.mxu1 %v3759_v55  ;;  %2063 = vmatprep.subr.bf16.mxu0 %v3760_v56  ;;  %v3838_v55 = vld [vmem:[#allocation10 + $0x7d0] ss:$40 sps:$4 sm:$0xff]  }
  0xc5   :  { %2145 = vmatprep.subr.bf16.mxu1 %v3762_v57  ;;  %v3841_v56 = vld [vmem:[#allocation10 + $0x7d8] ss:$40 sps:$4 sm:$0xff]   ;;  %v3846_v57 = vld [vmem:[#allocation10 + $0x824] ss:$40 sps:$4 sm:$0xff]  }
  0xc7   :  { %2064 = vmatpush1.bf16.msra.mxu0 %v3764_v59  ;;  %v3844_v59 = vld [vmem:[#allocation10 + $0x820] ss:$40 sps:$4 sm:$0xff]  }
  0xc8   :  { %2146 = vmatpush1.bf16.msra.mxu1 %v3765_v61  ;;  %2065 = vmatprep.subr.bf16.mxu0 %v3766_v62  ;;  %v3847_v61 = vld [vmem:[#allocation10 + $0x828] ss:$40 sps:$4 sm:$0xff]   ;;  %v3852_v62 = vld [vmem:[#allocation10 + $0x874] ss:$40 sps:$4 sm:$0xff]  }
  0xc9   :  { %2147 = vmatprep.subr.bf16.mxu1 %v3768_v63  ;;  %v3855_v63 = vld [vmem:[#allocation10 + $0x87c] ss:$40 sps:$4 sm:$0xff]  }
  0xcb   :  { %2066 = vmatpush1.bf16.msra.mxu0 %v3770_v0  ;;  %v520_v0 = vld [vmem:[#allocation10 + $0x8c0] sm:$0x11] }
  0xcc   :  { %2148 = vmatpush1.bf16.msra.mxu1 %v3771_v1  ;;  %2067 = vmatprep.subr.bf16.mxu0 %v3772_v2  ;;  %v521_v1 = vld [vmem:[#allocation10 + $0x8c8] sm:$0x11]  ;;  %v3850_v2 = vld [vmem:[#allocation10 + $0x870] ss:$40 sps:$4 sm:$0xff]   ;;  %v3523_v4 = vcombine.high %v520_v0, %v520_v0 }
  0xcd   :  { %2149 = vmatprep.subr.bf16.mxu1 %v3774_v3  ;;  %v3853_v3 = vld [vmem:[#allocation10 + $0x878] ss:$40 sps:$4 sm:$0xff]  }
  0xcf   :  { %2068 = vmatpush1.bf16.msra.mxu0 %v3776_v5  ;;  %v3525_v5 = vcombine.high %v521_v1, %v521_v1 }
  0xd0   :  { %2150 = vmatpush1.bf16.msra.mxu1 %v3777_v6  ;;  %2069 = vmatprep.subr.bf16.mxu0 %v3778_v7  ;;  %v3522_v6 = vcombine.low %v520_v0, %v520_v0  ;;  %v3524_v7 = vcombine.low %v521_v1, %v521_v1  ;;  %v3935_v0 = vld [vmem:[#allocation10 + $0x3d4] ss:$40 sps:$4 sm:$0xff]  }
  0xd1   :  { %2151 = vmatprep.subr.bf16.mxu1 %v3780_v8  ;;  %v3863_v8 = vld [vmem:[#allocation10 + $0x14] ss:$40 sps:$4 sm:$0xff]  }
  0xd2   :  { %v3938_v1 = vld [vmem:[#allocation10 + $0x3dc] ss:$40 sps:$4 sm:$0xff]  }
  0xd3   :  { %2070 = vmatpush1.bf16.msra.mxu0 %v3782_v10  ;;  %v2010_v10 = vsel %vm2008_vm1, %v3522_v6, 0  ;;  %v3939_v6 = vld [vmem:[#allocation10 + $0x420] ss:$40 sps:$4 sm:$0xff]  }
  0xd4   :  { %2152 = vmatpush1.bf16.msra.mxu1 %v3783_v11  ;;  %2080 = vmatprep.subr.bf16.mxu0 %v3786_v12  ;;  %v2016_v11 = vsel %vm2008_vm1, %v3524_v7, 0  ;;  %v3866_v12 = vld [vmem:[#allocation10 + $0x1c] ss:$40 sps:$4 sm:$0xff]   ;;  %v3942_v7 = vld [vmem:[#allocation10 + $0x428] ss:$40 sps:$4 sm:$0xff]  }
  0xd5   :  { %2162 = vmatprep.subr.bf16.mxu1 %v3789_v13  ;;  %v4624_v13 = vpack.c.bf16 %v4604_v9, %v4604_v9  ;;  %v3878_v9 = vld [vmem:[#allocation10 + $0xbc] ss:$40 sps:$4 sm:$0xff]  }
  0xd6   :  { %2072 = vmatmul.mubr.bf16.vlgmr.msra.gmra.mrb[0].mxu0 %v4608_v16 }
  0xd7   :  { %2154 = vmatmul.mubr.bf16.vlgmr.msra.gmra.mrb[0].mxu1 %v4608_v16  ;;  %2081 = vmatpush1.bf16.msra.mxu0 %v3784_v15  ;;  %v3864_v15 = vld [vmem:[#allocation10 + $0x18] ss:$40 sps:$4 sm:$0xff]  }
  0xd8   :  { %2163 = vmatpush1.bf16.msra.mxu1 %v3787_v17  ;;  %2082 = vmatprep.subr.bf16.mxu0 %v3792_v18  ;;  %v3869_v17 = vld [vmem:[#allocation10 + $0x64] ss:$40 sps:$4 sm:$0xff]  }
  0xd9   :  { %2164 = vmatprep.subr.bf16.mxu1 %v3795_v19  ;;  %3533 = vmatprep.mubr.msk.bf16.mxu0 %vm2004_vm0, %v4610_v20  ;;  %v3872_v18 = vld [vmem:[#allocation10 + $0x6c] ss:$40 sps:$4 sm:$0xff]   ;;  %v3867_v19 = vld [vmem:[#allocation10 + $0x60] ss:$40 sps:$4 sm:$0xff]  }
  0xda   :  { %3535 = vmatprep.mubr.msk.bf16.mxu1 %vm2004_vm0, %v4610_v20 }
  0xdb   :  { %2083 = vmatpush1.bf16.msra.mxu0 %v3790_v21  ;;  %v3870_v21 = vld [vmem:[#allocation10 + $0x68] ss:$40 sps:$4 sm:$0xff]  }
  0xdc   :  { %2165 = vmatpush1.bf16.msra.mxu1 %v3793_v22  ;;  %2084 = vmatprep.subr.bf16.mxu0 %v3798_v23  ;;  %v3875_v22 = vld [vmem:[#allocation10 + $0xb4] ss:$40 sps:$4 sm:$0xff]   ;;  %v3873_v23 = vld [vmem:[#allocation10 + $0xb0] ss:$40 sps:$4 sm:$0xff]  }
  0xdd   :  { %2166 = vmatprep.subr.bf16.mxu1 %v3801_v24  ;;  %v3876_v24 = vld [vmem:[#allocation10 + $0xb8] ss:$40 sps:$4 sm:$0xff]  }
  0xdf   :  { %2085 = vmatpush1.bf16.msra.mxu0 %v3796_v25  ;;  %v3881_v25 = vld [vmem:[#allocation10 + $0x104] ss:$40 sps:$4 sm:$0xff]  }
  0xe0   :  { %2167 = vmatpush1.bf16.msra.mxu1 %v3799_v26  ;;  %2086 = vmatprep.subr.bf16.mxu0 %v3804_v27  ;;  %v3884_v26 = vld [vmem:[#allocation10 + $0x10c] ss:$40 sps:$4 sm:$0xff]   ;;  %v3879_v27 = vld [vmem:[#allocation10 + $0x100] ss:$40 sps:$4 sm:$0xff]  }
  0xe1   :  { %2168 = vmatprep.subr.bf16.mxu1 %v3807_v28  ;;  %v3882_v28 = vld [vmem:[#allocation10 + $0x108] ss:$40 sps:$4 sm:$0xff]  }
  0xe3   :  { %2087 = vmatpush1.bf16.msra.mxu0 %v3802_v29  ;;  %v3887_v29 = vld [vmem:[#allocation10 + $0x154] ss:$40 sps:$4 sm:$0xff]  }
  0xe4   :  { %2169 = vmatpush1.bf16.msra.mxu1 %v3805_v30  ;;  %2088 = vmatprep.subr.bf16.mxu0 %v3810_v31  ;;  %v3890_v30 = vld [vmem:[#allocation10 + $0x15c] ss:$40 sps:$4 sm:$0xff]   ;;  %v3885_v31 = vld [vmem:[#allocation10 + $0x150] ss:$40 sps:$4 sm:$0xff]  }
  0xe5   :  { %2170 = vmatprep.subr.bf16.mxu1 %v3813_v32  ;;  %v3888_v32 = vld [vmem:[#allocation10 + $0x158] ss:$40 sps:$4 sm:$0xff]  }
  0xe7   :  { %2089 = vmatpush1.bf16.msra.mxu0 %v3808_v33  ;;  %v3893_v33 = vld [vmem:[#allocation10 + $0x1a4] ss:$40 sps:$4 sm:$0xff]  }
  0xe8   :  { %2171 = vmatpush1.bf16.msra.mxu1 %v3811_v34  ;;  %2090 = vmatprep.subr.bf16.mxu0 %v3816_v35  ;;  %v3896_v34 = vld [vmem:[#allocation10 + $0x1ac] ss:$40 sps:$4 sm:$0xff]   ;;  %v3891_v35 = vld [vmem:[#allocation10 + $0x1a0] ss:$40 sps:$4 sm:$0xff]  }
  0xe9   :  { %2172 = vmatprep.subr.bf16.mxu1 %v3819_v36  ;;  %v3894_v36 = vld [vmem:[#allocation10 + $0x1a8] ss:$40 sps:$4 sm:$0xff]  }
  0xeb   :  { %2091 = vmatpush1.bf16.msra.mxu0 %v3814_v37  ;;  %v3899_v37 = vld [vmem:[#allocation10 + $0x1f4] ss:$40 sps:$4 sm:$0xff]  }
  0xec   :  { %2173 = vmatpush1.bf16.msra.mxu1 %v3817_v38  ;;  %2092 = vmatprep.subr.bf16.mxu0 %v3822_v39  ;;  %v3902_v38 = vld [vmem:[#allocation10 + $0x1fc] ss:$40 sps:$4 sm:$0xff]   ;;  %v3897_v39 = vld [vmem:[#allocation10 + $0x1f0] ss:$40 sps:$4 sm:$0xff]  }
  0xed   :  { %2174 = vmatprep.subr.bf16.mxu1 %v3825_v40  ;;  %v3900_v40 = vld [vmem:[#allocation10 + $0x1f8] ss:$40 sps:$4 sm:$0xff]  }
  0xef   :  { %2093 = vmatpush1.bf16.msra.mxu0 %v3820_v41  ;;  %v3905_v41 = vld [vmem:[#allocation10 + $0x244] ss:$40 sps:$4 sm:$0xff]  }
  0xf0   :  { %2175 = vmatpush1.bf16.msra.mxu1 %v3823_v42  ;;  %2094 = vmatprep.subr.bf16.mxu0 %v3828_v44  ;;  %v3908_v42 = vld [vmem:[#allocation10 + $0x24c] ss:$40 sps:$4 sm:$0xff]   ;;  %v3903_v44 = vld [vmem:[#allocation10 + $0x240] ss:$40 sps:$4 sm:$0xff]  }
  0xf1   :  { %2176 = vmatprep.subr.bf16.mxu1 %v3831_v45  ;;  %v3906_v45 = vld [vmem:[#allocation10 + $0x248] ss:$40 sps:$4 sm:$0xff]  }
  0xf3   :  { %2095 = vmatpush1.bf16.msra.mxu0 %v3826_v46  ;;  %v3911_v46 = vld [vmem:[#allocation10 + $0x294] ss:$40 sps:$4 sm:$0xff]  }
  0xf4   :  { %2177 = vmatpush1.bf16.msra.mxu1 %v3829_v47  ;;  %2096 = vmatprep.subr.bf16.mxu0 %v3834_v48  ;;  %v3914_v47 = vld [vmem:[#allocation10 + $0x29c] ss:$40 sps:$4 sm:$0xff]   ;;  %v3909_v48 = vld [vmem:[#allocation10 + $0x290] ss:$40 sps:$4 sm:$0xff]  }
  0xf5   :  { %2178 = vmatprep.subr.bf16.mxu1 %v3837_v50  ;;  %v3912_v50 = vld [vmem:[#allocation10 + $0x298] ss:$40 sps:$4 sm:$0xff]  }
  0xf7   :  { %2097 = vmatpush1.bf16.msra.mxu0 %v3832_v51  ;;  %v3917_v51 = vld [vmem:[#allocation10 + $0x2e4] ss:$40 sps:$4 sm:$0xff]  }
  0xf8   :  { %2179 = vmatpush1.bf16.msra.mxu1 %v3835_v52  ;;  %2098 = vmatprep.subr.bf16.mxu0 %v3840_v53  ;;  %v3920_v52 = vld [vmem:[#allocation10 + $0x2ec] ss:$40 sps:$4 sm:$0xff]   ;;  %v3915_v53 = vld [vmem:[#allocation10 + $0x2e0] ss:$40 sps:$4 sm:$0xff]  }
  0xf9   :  { %2180 = vmatprep.subr.bf16.mxu1 %v3843_v54  ;;  %v3918_v54 = vld [vmem:[#allocation10 + $0x2e8] ss:$40 sps:$4 sm:$0xff]  }
  0xfb   :  { %2099 = vmatpush1.bf16.msra.mxu0 %v3838_v55  ;;  %v3923_v55 = vld [vmem:[#allocation10 + $0x334] ss:$40 sps:$4 sm:$0xff]  }
  0xfc   :  { %2181 = vmatpush1.bf16.msra.mxu1 %v3841_v56  ;;  %2100 = vmatprep.subr.bf16.mxu0 %v3846_v57  ;;  %v3926_v56 = vld [vmem:[#allocation10 + $0x33c] ss:$40 sps:$4 sm:$0xff]   ;;  %v3921_v57 = vld [vmem:[#allocation10 + $0x330] ss:$40 sps:$4 sm:$0xff]  }
  0xfd   :  { %2182 = vmatprep.subr.bf16.mxu1 %v3849_v58  ;;  %v3924_v58 = vld [vmem:[#allocation10 + $0x338] ss:$40 sps:$4 sm:$0xff]  }
  0xff   :  { %2101 = vmatpush1.bf16.msra.mxu0 %v3844_v59  ;;  %v3929_v59 = vld [vmem:[#allocation10 + $0x384] ss:$40 sps:$4 sm:$0xff]  }
 0x100   :  { %2183 = vmatpush1.bf16.msra.mxu1 %v3847_v61  ;;  %2102 = vmatprep.subr.bf16.mxu0 %v3852_v62  ;;  %v3932_v61 = vld [vmem:[#allocation10 + $0x38c] ss:$40 sps:$4 sm:$0xff]   ;;  %v3927_v62 = vld [vmem:[#allocation10 + $0x380] ss:$40 sps:$4 sm:$0xff]  }
 0x101   :  { %2184 = vmatprep.subr.bf16.mxu1 %v3855_v63  ;;  %v3930_v63 = vld [vmem:[#allocation10 + $0x388] ss:$40 sps:$4 sm:$0xff]  }
 0x103   :  { %2103 = vmatpush1.bf16.msra.mxu0 %v3850_v2  ;;  %v3933_v2 = vld [vmem:[#allocation10 + $0x3d0] ss:$40 sps:$4 sm:$0xff]  }
 0x104   :  { %2185 = vmatpush1.bf16.msra.mxu1 %v3853_v3  ;;  %3532 = vmatprep.subr.msk.bf16.mxu0 %vm2008_vm1, %v3523_v4  ;;  %v3936_v3 = vld [vmem:[#allocation10 + $0x3d8] ss:$40 sps:$4 sm:$0xff]   ;;  %v3941_v4 = vld [vmem:[#allocation10 + $0x424] ss:$40 sps:$4 sm:$0xff]  }
 0x105   :  { %3534 = vmatprep.subr.msk.bf16.mxu1 %vm2008_vm1, %v3525_v5  ;;  %v3944_v5 = vld [vmem:[#allocation10 + $0x42c] ss:$40 sps:$4 sm:$0xff]  }
 0x107   :  { %2105 = vmatpush1.bf16.msra.mxu0 %v2010_v10  ;;  %v3950_v10 = vld [vmem:[#allocation10 + $0x47c] ss:$40 sps:$4 sm:$0xff]  }
 0x108   :  { %2187 = vmatpush1.bf16.msra.mxu1 %v2016_v11  ;;  %2203 = vmatprep.subr.bf16.mxu0 %v3863_v8  ;;  %v3947_v8 = vld [vmem:[#allocation10 + $0x474] ss:$40 sps:$4 sm:$0xff]   ;;  %v3945_v11 = vld [vmem:[#allocation10 + $0x470] ss:$40 sps:$4 sm:$0xff]  }
 0x109   :  { %2285 = vmatprep.subr.bf16.mxu1 %v3866_v12  ;;  %v3948_v12 = vld [vmem:[#allocation10 + $0x478] ss:$40 sps:$4 sm:$0xff]  }
 0x10a   :  { %2113 = vmatmul.mubr.bf16.vlgmr.msra.gmra.mrb[0].mxu0 %v4624_v13 }
 0x10b   :  { %2195 = vmatmul.mubr.bf16.vlgmr.msra.gmra.mrb[0].mxu1 %v4624_v13  ;;  %2204 = vmatpush1.bf16.msra.mxu0 %v3861_v14  ;;  %v3953_v14 = vld [vmem:[#allocation10 + $0x4c4] ss:$40 sps:$4 sm:$0xff]  }
 0x10c   :  { %2286 = vmatpush1.bf16.msra.mxu1 %v3864_v15  ;;  %2205 = vmatprep.subr.bf16.mxu0 %v3869_v17  ;;  %v3956_v15 = vld [vmem:[#allocation10 + $0x4cc] ss:$40 sps:$4 sm:$0xff]   ;;  %v3951_v17 = vld [vmem:[#allocation10 + $0x4c0] ss:$40 sps:$4 sm:$0xff]  }
 0x10d   :  { %2287 = vmatprep.subr.bf16.mxu1 %v3872_v18  ;;  %2235 = vmatprep.mubr.bf16.mxu0 %v4599_v60  ;;  %v3954_v18 = vld [vmem:[#allocation10 + $0x4c8] ss:$40 sps:$4 sm:$0xff]  }
 0x10e   :  { %2317 = vmatprep.mubr.bf16.mxu1 %v4599_v60 }
 0x10f   :  { %2206 = vmatpush1.bf16.msra.mxu0 %v3867_v19  ;;  %v3959_v19 = vld [vmem:[#allocation10 + $0x514] ss:$40 sps:$4 sm:$0xff]  }
 0x110   :  { %2288 = vmatpush1.bf16.msra.mxu1 %v3870_v21  ;;  %2207 = vmatprep.subr.bf16.mxu0 %v3875_v22  ;;  %v3962_v21 = vld [vmem:[#allocation10 + $0x51c] ss:$40 sps:$4 sm:$0xff]   ;;  %v3957_v22 = vld [vmem:[#allocation10 + $0x510] ss:$40 sps:$4 sm:$0xff]  }
 0x111   :  { %2289 = vmatprep.subr.bf16.mxu1 %v3878_v9  ;;  %v3960_v9 = vld [vmem:[#allocation10 + $0x518] ss:$40 sps:$4 sm:$0xff]  }
 0x113   :  { %2208 = vmatpush1.bf16.msra.mxu0 %v3873_v23  ;;  %v3965_v23 = vld [vmem:[#allocation10 + $0x564] ss:$40 sps:$4 sm:$0xff]  }
 0x114   :  { %2290 = vmatpush1.bf16.msra.mxu1 %v3876_v24  ;;  %2209 = vmatprep.subr.bf16.mxu0 %v3881_v25  ;;  %v3968_v24 = vld [vmem:[#allocation10 + $0x56c] ss:$40 sps:$4 sm:$0xff]   ;;  %v3963_v25 = vld [vmem:[#allocation10 + $0x560] ss:$40 sps:$4 sm:$0xff]  }
 0x115   :  { %2291 = vmatprep.subr.bf16.mxu1 %v3884_v26  ;;  %v3966_v26 = vld [vmem:[#allocation10 + $0x568] ss:$40 sps:$4 sm:$0xff]  }
 0x117   :  { %2210 = vmatpush1.bf16.msra.mxu0 %v3879_v27  ;;  %v3971_v27 = vld [vmem:[#allocation10 + $0x5b4] ss:$40 sps:$4 sm:$0xff]  }
 0x118   :  { %2292 = vmatpush1.bf16.msra.mxu1 %v3882_v28  ;;  %2211 = vmatprep.subr.bf16.mxu0 %v3887_v29  ;;  %v3974_v28 = vld [vmem:[#allocation10 + $0x5bc] ss:$40 sps:$4 sm:$0xff]   ;;  %v3969_v29 = vld [vmem:[#allocation10 + $0x5b0] ss:$40 sps:$4 sm:$0xff]  }
 0x119   :  { %2293 = vmatprep.subr.bf16.mxu1 %v3890_v30  ;;  %v3972_v30 = vld [vmem:[#allocation10 + $0x5b8] ss:$40 sps:$4 sm:$0xff]  }
 0x11b   :  { %2212 = vmatpush1.bf16.msra.mxu0 %v3885_v31  ;;  %v3977_v31 = vld [vmem:[#allocation10 + $0x604] ss:$40 sps:$4 sm:$0xff]  }
 0x11c   :  { %2294 = vmatpush1.bf16.msra.mxu1 %v3888_v32  ;;  %2213 = vmatprep.subr.bf16.mxu0 %v3893_v33  ;;  %v3980_v32 = vld [vmem:[#allocation10 + $0x60c] ss:$40 sps:$4 sm:$0xff]   ;;  %v3975_v33 = vld [vmem:[#allocation10 + $0x600] ss:$40 sps:$4 sm:$0xff]  }
 0x11d   :  { %2295 = vmatprep.subr.bf16.mxu1 %v3896_v34  ;;  %v3978_v34 = vld [vmem:[#allocation10 + $0x608] ss:$40 sps:$4 sm:$0xff]  }
 0x11f   :  { %2214 = vmatpush1.bf16.msra.mxu0 %v3891_v35  ;;  %v3983_v35 = vld [vmem:[#allocation10 + $0x654] ss:$40 sps:$4 sm:$0xff]  }
 0x120   :  { %2296 = vmatpush1.bf16.msra.mxu1 %v3894_v36  ;;  %2215 = vmatprep.subr.bf16.mxu0 %v3899_v37  ;;  %v3986_v36 = vld [vmem:[#allocation10 + $0x65c] ss:$40 sps:$4 sm:$0xff]   ;;  %v3981_v37 = vld [vmem:[#allocation10 + $0x650] ss:$40 sps:$4 sm:$0xff]  }
 0x121   :  { %2297 = vmatprep.subr.bf16.mxu1 %v3902_v38  ;;  %v3984_v38 = vld [vmem:[#allocation10 + $0x658] ss:$40 sps:$4 sm:$0xff]  }
 0x123   :  { %2216 = vmatpush1.bf16.msra.mxu0 %v3897_v39  ;;  %v3989_v39 = vld [vmem:[#allocation10 + $0x6a4] ss:$40 sps:$4 sm:$0xff]  }
 0x124   :  { %2298 = vmatpush1.bf16.msra.mxu1 %v3900_v40  ;;  %2217 = vmatprep.subr.bf16.mxu0 %v3905_v41  ;;  %v3992_v40 = vld [vmem:[#allocation10 + $0x6ac] ss:$40 sps:$4 sm:$0xff]   ;;  %v3987_v41 = vld [vmem:[#allocation10 + $0x6a0] ss:$40 sps:$4 sm:$0xff]  }
 0x125   :  { %2299 = vmatprep.subr.bf16.mxu1 %v3908_v42  ;;  %v3990_v42 = vld [vmem:[#allocation10 + $0x6a8] ss:$40 sps:$4 sm:$0xff]  }
 0x127   :  { %2218 = vmatpush1.bf16.msra.mxu0 %v3903_v44  ;;  %v3995_v44 = vld [vmem:[#allocation10 + $0x6f4] ss:$40 sps:$4 sm:$0xff]  }
 0x128   :  { %2300 = vmatpush1.bf16.msra.mxu1 %v3906_v45  ;;  %2219 = vmatprep.subr.bf16.mxu0 %v3911_v46  ;;  %v3998_v45 = vld [vmem:[#allocation10 + $0x6fc] ss:$40 sps:$4 sm:$0xff]   ;;  %v3993_v46 = vld [vmem:[#allocation10 + $0x6f0] ss:$40 sps:$4 sm:$0xff]  }
 0x129   :  { %2301 = vmatprep.subr.bf16.mxu1 %v3914_v47  ;;  %v3996_v47 = vld [vmem:[#allocation10 + $0x6f8] ss:$40 sps:$4 sm:$0xff]  }
 0x12b   :  { %2220 = vmatpush1.bf16.msra.mxu0 %v3909_v48  ;;  %v4001_v48 = vld [vmem:[#allocation10 + $0x744] ss:$40 sps:$4 sm:$0xff]  }
 0x12c   :  { %2302 = vmatpush1.bf16.msra.mxu1 %v3912_v50  ;;  %2221 = vmatprep.subr.bf16.mxu0 %v3917_v51  ;;  %v4004_v50 = vld [vmem:[#allocation10 + $0x74c] ss:$40 sps:$4 sm:$0xff]   ;;  %v3999_v51 = vld [vmem:[#allocation10 + $0x740] ss:$40 sps:$4 sm:$0xff]  }
 0x12d   :  { %2303 = vmatprep.subr.bf16.mxu1 %v3920_v52  ;;  %v4002_v52 = vld [vmem:[#allocation10 + $0x748] ss:$40 sps:$4 sm:$0xff]  }
 0x12f   :  { %2222 = vmatpush1.bf16.msra.mxu0 %v3915_v53  ;;  %v4007_v53 = vld [vmem:[#allocation10 + $0x794] ss:$40 sps:$4 sm:$0xff]  }
 0x130   :  { %2304 = vmatpush1.bf16.msra.mxu1 %v3918_v54  ;;  %2223 = vmatprep.subr.bf16.mxu0 %v3923_v55  ;;  %v4010_v54 = vld [vmem:[#allocation10 + $0x79c] ss:$40 sps:$4 sm:$0xff]   ;;  %v4005_v55 = vld [vmem:[#allocation10 + $0x790] ss:$40 sps:$4 sm:$0xff]  }
 0x131   :  { %2305 = vmatprep.subr.bf16.mxu1 %v3926_v56  ;;  %v4008_v56 = vld [vmem:[#allocation10 + $0x798] ss:$40 sps:$4 sm:$0xff]  }
 0x133   :  { %2224 = vmatpush1.bf16.msra.mxu0 %v3921_v57  ;;  %v4013_v57 = vld [vmem:[#allocation10 + $0x7e4] ss:$40 sps:$4 sm:$0xff]  }
 0x134   :  { %2306 = vmatpush1.bf16.msra.mxu1 %v3924_v58  ;;  %2225 = vmatprep.subr.bf16.mxu0 %v3929_v59  ;;  %v4016_v58 = vld [vmem:[#allocation10 + $0x7ec] ss:$40 sps:$4 sm:$0xff]   ;;  %v4011_v59 = vld [vmem:[#allocation10 + $0x7e0] ss:$40 sps:$4 sm:$0xff]  }
 0x135   :  { %2307 = vmatprep.subr.bf16.mxu1 %v3932_v61  ;;  %v4014_v61 = vld [vmem:[#allocation10 + $0x7e8] ss:$40 sps:$4 sm:$0xff]  }
 0x137   :  { %2226 = vmatpush1.bf16.msra.mxu0 %v3927_v62  ;;  %v4019_v62 = vld [vmem:[#allocation10 + $0x834] ss:$40 sps:$4 sm:$0xff]  }
 0x138   :  { %2308 = vmatpush1.bf16.msra.mxu1 %v3930_v63  ;;  %2227 = vmatprep.subr.bf16.mxu0 %v3935_v0  ;;  %v4022_v63 = vld [vmem:[#allocation10 + $0x83c] ss:$40 sps:$4 sm:$0xff]   ;;  %v4017_v0 = vld [vmem:[#allocation10 + $0x830] ss:$40 sps:$4 sm:$0xff]  }
 0x139   :  { %2309 = vmatprep.subr.bf16.mxu1 %v3938_v1  ;;  %v4020_v1 = vld [vmem:[#allocation10 + $0x838] ss:$40 sps:$4 sm:$0xff]  }
 0x13b   :  { %2228 = vmatpush1.bf16.msra.mxu0 %v3933_v2  ;;  %v4025_v2 = vld [vmem:[#allocation10 + $0x884] ss:$40 sps:$4 sm:$0xff]  }
 0x13c   :  { %2310 = vmatpush1.bf16.msra.mxu1 %v3936_v3  ;;  %2229 = vmatprep.subr.bf16.mxu0 %v3941_v4  ;;  %v4028_v3 = vld [vmem:[#allocation10 + $0x88c] ss:$40 sps:$4 sm:$0xff]  }
 0x13d   :  { %2311 = vmatprep.subr.bf16.mxu1 %v3944_v5  ;;  %v522_v4 = vld [vmem:[#allocation10 + $0x8d0] sm:$0x11]  ;;  %v523_v5 = vld [vmem:[#allocation10 + $0x8d8] sm:$0x11] }
 0x13f   :  { %2230 = vmatpush1.bf16.msra.mxu0 %v3939_v6  ;;  %v4023_v6 = vld [vmem:[#allocation10 + $0x880] ss:$40 sps:$4 sm:$0xff]  }
 0x140   :  { %2312 = vmatpush1.bf16.msra.mxu1 %v3942_v7  ;;  %2231 = vmatprep.subr.bf16.mxu0 %v3947_v8  ;;  %v4026_v7 = vld [vmem:[#allocation10 + $0x888] ss:$40 sps:$4 sm:$0xff]   ;;  %v3527_v8 = vcombine.high %v522_v4, %v522_v4 }
 0x141   :  { %2313 = vmatprep.subr.bf16.mxu1 %v3950_v10  ;;  %v3529_v10 = vcombine.high %v523_v5, %v523_v5 }
 0x143   :  { %2232 = vmatpush1.bf16.msra.mxu0 %v3945_v11  ;;  %v3526_v11 = vcombine.low %v522_v4, %v522_v4 }
 0x144   :  { %2314 = vmatpush1.bf16.msra.mxu1 %v3948_v12  ;;  %2233 = vmatprep.subr.bf16.mxu0 %v3953_v14  ;;  %v3528_v12 = vcombine.low %v523_v5, %v523_v5 }
 0x145   :  { %2315 = vmatprep.subr.bf16.mxu1 %v3956_v15  ;;  %v2022_v14 = vsel %vm2008_vm1, %v3526_v11, 0 }
 0x146   :  { %v2028_v15 = vsel %vm2008_vm1, %v3528_v12, 0 }
 0x147   :  { %2234 = vmatpush1.bf16.msra.mxu0 %v3951_v17  ;;  %v4035_v17 = vld [vmem:[#allocation10 + $0x24] ss:$40 sps:$4 sm:$0xff]  }
 0x148   :  { %2316 = vmatpush1.bf16.msra.mxu1 %v3954_v18  ;;  %2244 = vmatprep.subr.bf16.mxu0 %v3959_v19  ;;  %v4033_v18 = vld [vmem:[#allocation10 + $0x20] ss:$40 sps:$4 sm:$0xff]   ;;  %v4038_v19 = vld [vmem:[#allocation10 + $0x74] ss:$40 sps:$4 sm:$0xff]  }
 0x149   :  { %2326 = vmatprep.subr.bf16.mxu1 %v3962_v21  ;;  %v4036_v21 = vld [vmem:[#allocation10 + $0x70] ss:$40 sps:$4 sm:$0xff]  }
 0x14a   :  { %2236 = vmatmul.mubr.bf16.vlgmr.msra.gmra.mrb[4].mxu0 %v4608_v16 }
 0x14b   :  { %2318 = vmatmul.mubr.bf16.vlgmr.msra.gmra.mrb[4].mxu1 %v4608_v16  ;;  %2245 = vmatpush1.bf16.msra.mxu0 %v3957_v22  ;;  %v4041_v22 = vld [vmem:[#allocation10 + $0xc4] ss:$40 sps:$4 sm:$0xff]  }
 0x14c   :  { %2327 = vmatpush1.bf16.msra.mxu1 %v3960_v9  ;;  %2246 = vmatprep.subr.bf16.mxu0 %v3965_v23  ;;  %v4039_v9 = vld [vmem:[#allocation10 + $0xc0] ss:$40 sps:$4 sm:$0xff]   ;;  %v4044_v23 = vld [vmem:[#allocation10 + $0x114] ss:$40 sps:$4 sm:$0xff]  }
 0x14d   :  { %2328 = vmatprep.subr.bf16.mxu1 %v3968_v24  ;;  %3537 = vmatprep.mubr.msk.bf16.mxu0 %vm2004_vm0, %v4610_v20  ;;  %v4042_v24 = vld [vmem:[#allocation10 + $0x110] ss:$40 sps:$4 sm:$0xff]  }
 0x14e   :  { %3539 = vmatprep.mubr.msk.bf16.mxu1 %vm2004_vm0, %v4610_v20 }
 0x14f   :  { %2247 = vmatpush1.bf16.msra.mxu0 %v3963_v25  ;;  %v4047_v25 = vld [vmem:[#allocation10 + $0x164] ss:$40 sps:$4 sm:$0xff]  }
 0x150   :  { %2329 = vmatpush1.bf16.msra.mxu1 %v3966_v26  ;;  %2248 = vmatprep.subr.bf16.mxu0 %v3971_v27  ;;  %v4045_v26 = vld [vmem:[#allocation10 + $0x160] ss:$40 sps:$4 sm:$0xff]   ;;  %v4050_v27 = vld [vmem:[#allocation10 + $0x1b4] ss:$40 sps:$4 sm:$0xff]  }
 0x151   :  { %2330 = vmatprep.subr.bf16.mxu1 %v3974_v28  ;;  %v4048_v28 = vld [vmem:[#allocation10 + $0x1b0] ss:$40 sps:$4 sm:$0xff]  }
 0x153   :  { %2249 = vmatpush1.bf16.msra.mxu0 %v3969_v29  ;;  %v4053_v29 = vld [vmem:[#allocation10 + $0x204] ss:$40 sps:$4 sm:$0xff]  }
 0x154   :  { %2331 = vmatpush1.bf16.msra.mxu1 %v3972_v30  ;;  %2250 = vmatprep.subr.bf16.mxu0 %v3977_v31  ;;  %v4056_v30 = vld [vmem:[#allocation10 + $0x254] ss:$40 sps:$4 sm:$0xff]   ;;  %v4054_v31 = vld [vmem:[#allocation10 + $0x250] ss:$40 sps:$4 sm:$0xff]  }
 0x155   :  { %2332 = vmatprep.subr.bf16.mxu1 %v3980_v32  ;;  %v4059_v32 = vld [vmem:[#allocation10 + $0x2a4] ss:$40 sps:$4 sm:$0xff]  }
 0x157   :  { %2251 = vmatpush1.bf16.msra.mxu0 %v3975_v33  ;;  %v4057_v33 = vld [vmem:[#allocation10 + $0x2a0] ss:$40 sps:$4 sm:$0xff]  }
 0x158   :  { %2333 = vmatpush1.bf16.msra.mxu1 %v3978_v34  ;;  %2252 = vmatprep.subr.bf16.mxu0 %v3983_v35  ;;  %v4062_v34 = vld [vmem:[#allocation10 + $0x2f4] ss:$40 sps:$4 sm:$0xff]   ;;  %v4060_v35 = vld [vmem:[#allocation10 + $0x2f0] ss:$40 sps:$4 sm:$0xff]  }
 0x159   :  { %2334 = vmatprep.subr.bf16.mxu1 %v3986_v36  ;;  %v4065_v36 = vld [vmem:[#allocation10 + $0x344] ss:$40 sps:$4 sm:$0xff]  }
 0x15b   :  { %2253 = vmatpush1.bf16.msra.mxu0 %v3981_v37  ;;  %v4063_v37 = vld [vmem:[#allocation10 + $0x340] ss:$40 sps:$4 sm:$0xff]  }
 0x15c   :  { %2335 = vmatpush1.bf16.msra.mxu1 %v3984_v38  ;;  %2254 = vmatprep.subr.bf16.mxu0 %v3989_v39  ;;  %v4068_v38 = vld [vmem:[#allocation10 + $0x394] ss:$40 sps:$4 sm:$0xff]   ;;  %v4066_v39 = vld [vmem:[#allocation10 + $0x390] ss:$40 sps:$4 sm:$0xff]  }
 0x15d   :  { %2336 = vmatprep.subr.bf16.mxu1 %v3992_v40  ;;  %v4071_v40 = vld [vmem:[#allocation10 + $0x3e4] ss:$40 sps:$4 sm:$0xff]  }
 0x15f   :  { %2255 = vmatpush1.bf16.msra.mxu0 %v3987_v41  ;;  %v4069_v41 = vld [vmem:[#allocation10 + $0x3e0] ss:$40 sps:$4 sm:$0xff]  }
 0x160   :  { %2337 = vmatpush1.bf16.msra.mxu1 %v3990_v42  ;;  %2256 = vmatprep.subr.bf16.mxu0 %v3995_v44  ;;  %v4074_v42 = vld [vmem:[#allocation10 + $0x434] ss:$40 sps:$4 sm:$0xff]   ;;  %v4072_v44 = vld [vmem:[#allocation10 + $0x430] ss:$40 sps:$4 sm:$0xff]  }
 0x161   :  { %2338 = vmatprep.subr.bf16.mxu1 %v3998_v45  ;;  %v4077_v45 = vld [vmem:[#allocation10 + $0x484] ss:$40 sps:$4 sm:$0xff]  }
 0x163   :  { %2257 = vmatpush1.bf16.msra.mxu0 %v3993_v46  ;;  %v4075_v46 = vld [vmem:[#allocation10 + $0x480] ss:$40 sps:$4 sm:$0xff]  }
 0x164   :  { %2339 = vmatpush1.bf16.msra.mxu1 %v3996_v47  ;;  %2258 = vmatprep.subr.bf16.mxu0 %v4001_v48  ;;  %v4080_v47 = vld [vmem:[#allocation10 + $0x4d4] ss:$40 sps:$4 sm:$0xff]   ;;  %v4078_v48 = vld [vmem:[#allocation10 + $0x4d0] ss:$40 sps:$4 sm:$0xff]  }
 0x165   :  { %2340 = vmatprep.subr.bf16.mxu1 %v4004_v50  ;;  %v4083_v50 = vld [vmem:[#allocation10 + $0x524] ss:$40 sps:$4 sm:$0xff]  }
 0x167   :  { %2259 = vmatpush1.bf16.msra.mxu0 %v3999_v51  ;;  %v4081_v51 = vld [vmem:[#allocation10 + $0x520] ss:$40 sps:$4 sm:$0xff]  }
 0x168   :  { %2341 = vmatpush1.bf16.msra.mxu1 %v4002_v52  ;;  %2260 = vmatprep.subr.bf16.mxu0 %v4007_v53  ;;  %v4086_v52 = vld [vmem:[#allocation10 + $0x574] ss:$40 sps:$4 sm:$0xff]   ;;  %v4084_v53 = vld [vmem:[#allocation10 + $0x570] ss:$40 sps:$4 sm:$0xff]  }
 0x169   :  { %2342 = vmatprep.subr.bf16.mxu1 %v4010_v54  ;;  %v4089_v54 = vld [vmem:[#allocation10 + $0x5c4] ss:$40 sps:$4 sm:$0xff]  }
 0x16b   :  { %2261 = vmatpush1.bf16.msra.mxu0 %v4005_v55  ;;  %v4087_v55 = vld [vmem:[#allocation10 + $0x5c0] ss:$40 sps:$4 sm:$0xff]  }
 0x16c   :  { %2343 = vmatpush1.bf16.msra.mxu1 %v4008_v56  ;;  %2262 = vmatprep.subr.bf16.mxu0 %v4013_v57  ;;  %v4092_v56 = vld [vmem:[#allocation10 + $0x614] ss:$40 sps:$4 sm:$0xff]   ;;  %v4090_v57 = vld [vmem:[#allocation10 + $0x610] ss:$40 sps:$4 sm:$0xff]  }
 0x16d   :  { %2344 = vmatprep.subr.bf16.mxu1 %v4016_v58  ;;  %v4095_v58 = vld [vmem:[#allocation10 + $0x664] ss:$40 sps:$4 sm:$0xff]  }
 0x16f   :  { %2263 = vmatpush1.bf16.msra.mxu0 %v4011_v59  ;;  %v4093_v59 = vld [vmem:[#allocation10 + $0x660] ss:$40 sps:$4 sm:$0xff]  }
 0x170   :  { %2345 = vmatpush1.bf16.msra.mxu1 %v4014_v61  ;;  %2264 = vmatprep.subr.bf16.mxu0 %v4019_v62  ;;  %v4098_v61 = vld [vmem:[#allocation10 + $0x6b4] ss:$40 sps:$4 sm:$0xff]   ;;  %v4101_v62 = vld [vmem:[#allocation10 + $0x704] ss:$40 sps:$4 sm:$0xff]  }
 0x171   :  { %2346 = vmatprep.subr.bf16.mxu1 %v4022_v63  ;;  %v4104_v63 = vld [vmem:[#allocation10 + $0x754] ss:$40 sps:$4 sm:$0xff]  }
 0x173   :  { %2265 = vmatpush1.bf16.msra.mxu0 %v4017_v0  ;;  %v4102_v0 = vld [vmem:[#allocation10 + $0x750] ss:$40 sps:$4 sm:$0xff]  }
 0x174   :  { %2347 = vmatpush1.bf16.msra.mxu1 %v4020_v1  ;;  %2266 = vmatprep.subr.bf16.mxu0 %v4025_v2  ;;  %v4107_v1 = vld [vmem:[#allocation10 + $0x7a4] ss:$40 sps:$4 sm:$0xff]   ;;  %v4105_v2 = vld [vmem:[#allocation10 + $0x7a0] ss:$40 sps:$4 sm:$0xff]  }
 0x175   :  { %2348 = vmatprep.subr.bf16.mxu1 %v4028_v3  ;;  %v4110_v3 = vld [vmem:[#allocation10 + $0x7f4] ss:$40 sps:$4 sm:$0xff]  }
 0x177   :  { %2267 = vmatpush1.bf16.msra.mxu0 %v4023_v6 }
 0x178   :  { %2349 = vmatpush1.bf16.msra.mxu1 %v4026_v7  ;;  %3536 = vmatprep.subr.msk.bf16.mxu0 %vm2008_vm1, %v3527_v8 }
 0x179   :  { %3538 = vmatprep.subr.msk.bf16.mxu1 %vm2008_vm1, %v3529_v10  ;;  %v4108_v10 = vld [vmem:[#allocation10 + $0x7f0] ss:$40 sps:$4 sm:$0xff]  }
 0x17b   :  { %2269 = vmatpush1.bf16.msra.mxu0 %v2022_v14  ;;  %v4113_v14 = vld [vmem:[#allocation10 + $0x844] ss:$40 sps:$4 sm:$0xff]  }
 0x17c   :  { %2351 = vmatpush1.bf16.msra.mxu1 %v2028_v15  ;;  %2367 = vmatprep.subr.bf16.mxu0 %v4035_v17  ;;  %v4111_v17 = vld [vmem:[#allocation10 + $0x840] ss:$40 sps:$4 sm:$0xff]  }
 0x17e   :  { %2277 = vmatmul.mubr.bf16.vlgmr.msra.gmra.mrb[4].mxu0 %v4624_v13 }
 0x17f   :  { %2359 = vmatmul.mubr.bf16.vlgmr.msra.gmra.mrb[4].mxu1 %v4624_v13  ;;  %2368 = vmatpush1.bf16.msra.mxu0 %v4033_v18  ;;  %v4116_v18 = vld [vmem:[#allocation10 + $0x894] ss:$40 sps:$4 sm:$0xff]  }
 0x180   :  { %2399 = vmatprep.mubr.bf16.mxu0 %v4599_v60  ;;  %2369 = vmatprep.subr.bf16.mxu0 %v4038_v19  ;;  %v4051_v60 = vld [vmem:[#allocation10 + $0x200] ss:$40 sps:$4 sm:$0xff]  }
 0x181   :  { %v524_v19 = vld [vmem:[#allocation10 + $0x8e0] sm:$0x11] }
 0x183   :  { %2370 = vmatpush1.bf16.msra.mxu0 %v4036_v21  ;;  %v4114_v21 = vld [vmem:[#allocation10 + $0x890] ss:$40 sps:$4 sm:$0xff]  }
 0x184   :  { %2371 = vmatprep.subr.bf16.mxu0 %v4041_v22  ;;  %v3531_v22 = vcombine.high %v524_v19, %v524_v19 }
 0x187   :  { %2372 = vmatpush1.bf16.msra.mxu0 %v4039_v9  ;;  %v3530_v9 = vcombine.low %v524_v19, %v524_v19 }
 0x188   :  { %2373 = vmatprep.subr.bf16.mxu0 %v4044_v23 }
 0x189   :  { %v2034_v23 = vsel %vm2008_vm1, %v3530_v9, 0 }
 0x18b   :  { %2374 = vmatpush1.bf16.msra.mxu0 %v4042_v24  ;;  %v4652_v24 = vsub.s32 1, %v4593_v43 }
 0x18c   :  { %2375 = vmatprep.subr.bf16.mxu0 %v4047_v25  ;;  %v4654_v25 = vld [vmem:[#allocation12] sm:$0xff] }
 0x18f   :  { %2376 = vmatpush1.bf16.msra.mxu0 %v4045_v26  ;;  %v4657_v26 = vsub.s32 0, %v4593_v43 }
 0x190   :  { %2377 = vmatprep.subr.bf16.mxu0 %v4050_v27  ;;  %v539_v27 = vsub.s32 2, %v4593_v43 }
 0x193   :  { %2378 = vmatpush1.bf16.msra.mxu0 %v4048_v28  ;;  %v555_v28 = vsub.s32 6, %v4593_v43 }
 0x194   :  { %2379 = vmatprep.subr.bf16.mxu0 %v4053_v29  ;;  %v551_v29 = vsub.s32 5, %v4593_v43 }
 0x197   :  { %2380 = vmatpush1.bf16.msra.mxu0 %v4051_v60  ;;  %v559_v60 = vsub.s32 7, %v4593_v43 }
 0x198   :  { %2381 = vmatprep.subr.bf16.mxu0 %v4056_v30  ;;  %v536_v30 = vrot.slane %v4654_v25, %v4652_v24 }
 0x19b   :  { %2382 = vmatpush1.bf16.msra.mxu0 %v4054_v31  ;;  %v540_v31 = vrot.slane %v4654_v25, %v539_v27 }
 0x19c   :  { %2383 = vmatprep.subr.bf16.mxu0 %v4059_v32  ;;  %v556_v32 = vrot.slane %v4654_v25, %v555_v28 }
 0x19f   :  { %2384 = vmatpush1.bf16.msra.mxu0 %v4057_v33  ;;  %v552_v33 = vrot.slane %v4654_v25, %v551_v29 }
 0x1a0   :  { %2385 = vmatprep.subr.bf16.mxu0 %v4062_v34  ;;  %v560_v34 = vrot.slane %v4654_v25, %v559_v60 }
 0x1a3   :  { %2386 = vmatpush1.bf16.msra.mxu0 %v4060_v35 }
 0x1a4   :  { %2387 = vmatprep.subr.bf16.mxu0 %v4065_v36 }
 0x1a7   :  { %2388 = vmatpush1.bf16.msra.mxu0 %v4063_v37 }
 0x1a8   :  { %2389 = vmatprep.subr.bf16.mxu0 %v4068_v38 }
 0x1ab   :  { %2390 = vmatpush1.bf16.msra.mxu0 %v4066_v39 }
 0x1ac   :  { %2391 = vmatprep.subr.bf16.mxu0 %v4071_v40 }
 0x1af   :  { %2392 = vmatpush1.bf16.msra.mxu0 %v4069_v41 }
 0x1b0   :  { %2393 = vmatprep.subr.bf16.mxu0 %v4074_v42 }
 0x1b3   :  { %2394 = vmatpush1.bf16.msra.mxu0 %v4072_v44 }
 0x1b4   :  { %2395 = vmatprep.subr.bf16.mxu0 %v4077_v45 }
 0x1b7   :  { %2396 = vmatpush1.bf16.msra.mxu0 %v4075_v46 }
 0x1b8   :  { %2397 = vmatprep.subr.bf16.mxu0 %v4080_v47 }
 0x1bb   :  { %2398 = vmatpush1.bf16.msra.mxu0 %v4078_v48 }
 0x1bc   :  { %2408 = vmatprep.subr.bf16.mxu0 %v4083_v50 }
 0x1be   :  { %2400 = vmatmul.mubr.bf16.vlgmr.msra.gmra.mrb[8].mxu0 %v4608_v16  ;;  %v4096_v16 = vld [vmem:[#allocation10 + $0x6b0] ss:$40 sps:$4 sm:$0xff]  }
 0x1bf   :  { %2409 = vmatpush1.bf16.msra.mxu0 %v4081_v51  ;;  %3541 = vmatprep.mubr.msk.bf16.mxu0 %vm2004_vm0, %v4610_v20  ;;  %v4099_v20 = vld [vmem:[#allocation10 + $0x700] ss:$40 sps:$4 sm:$0xff]  }
 0x1c0   :  { %2410 = vmatprep.subr.bf16.mxu0 %v4086_v52 }
 0x1c3   :  { %2411 = vmatpush1.bf16.msra.mxu0 %v4084_v53 }
 0x1c4   :  { %2412 = vmatprep.subr.bf16.mxu0 %v4089_v54 }
 0x1c7   :  { %2413 = vmatpush1.bf16.msra.mxu0 %v4087_v55 }
 0x1c8   :  { %2414 = vmatprep.subr.bf16.mxu0 %v4092_v56 }
 0x1cb   :  { %2415 = vmatpush1.bf16.msra.mxu0 %v4090_v57 }
 0x1cc   :  { %2416 = vmatprep.subr.bf16.mxu0 %v4095_v58 }
 0x1cf   :  { %2417 = vmatpush1.bf16.msra.mxu0 %v4093_v59 }
 0x1d0   :  { %2418 = vmatprep.subr.bf16.mxu0 %v4098_v61 }
 0x1d3   :  { %2419 = vmatpush1.bf16.msra.mxu0 %v4096_v16 }
 0x1d4   :  { %2420 = vmatprep.subr.bf16.mxu0 %v4101_v62 }
 0x1d7   :  { %2421 = vmatpush1.bf16.msra.mxu0 %v4099_v20 }
 0x1d8   :  { %2422 = vmatprep.subr.bf16.mxu0 %v4104_v63 }
 0x1db   :  { %2423 = vmatpush1.bf16.msra.mxu0 %v4102_v0 }
 0x1dc   :  { %2424 = vmatprep.subr.bf16.mxu0 %v4107_v1 }
 0x1dd   :  { %v2114_v4 = vpop.f32.mrb[0].mxu0 }
 0x1de   :  { %v2196_v5 = vpop.f32.mrb[0].mxu1  ;;  %v2116_v6 = vpop.f32.mrb[1].mxu0 }
 0x1df   :  { %v4646_v7 = vpop.f32.mrb[1].mxu1  ;;  %v2118_v8 = vpop.f32.mrb[2].mxu0  ;;  %2425 = vmatpush1.bf16.msra.mxu0 %v4105_v2  ;;  %v3609_v35 = vadd.f32 %v2116_v6, %v536_v30  ;;  %v3610_v37 = vadd.f32 %v2196_v5, %v540_v31 }
 0x1e0   :  { %v2200_v11 = vpop.f32.mrb[2].mxu1  ;;  %v2119_v12 = vpop.f32.mrb[3].mxu0  ;;  %2426 = vmatprep.subr.bf16.mxu0 %v4110_v3 }
 0x1e1   :  { %v2201_v15 = vpop.f32.mrb[3].mxu1 }
 0x1e3   :  { %2427 = vmatpush1.bf16.msra.mxu0 %v4108_v10 }
 0x1e4   :  { %2428 = vmatprep.subr.bf16.mxu0 %v4113_v14 }
 0x1e7   :  { %2429 = vmatpush1.bf16.msra.mxu0 %v4111_v17 }
 0x1e8   :  { %2430 = vmatprep.subr.bf16.mxu0 %v4116_v18 }
 0x1eb   :  { %2431 = vmatpush1.bf16.msra.mxu0 %v4114_v21 }
 0x1ec   :  { %3540 = vmatprep.subr.msk.bf16.mxu0 %vm2008_vm1, %v3531_v22 }
 0x1ef   :  { %2433 = vmatpush1.bf16.msra.mxu0 %v2034_v23 }
 0x1f2   :  { %2441 = vmatmul.mubr.bf16.vlgmr.msra.gmra.mrb[8].mxu0 %v4624_v13  ;;  %v532_v13 = vrot.slane %v4654_v25, %v4657_v26 }
 0x1f4   :  { %v3608_v36 = vadd.f32 %v2114_v4, %v532_v13 }
 0x251   :  { %v2278_v38 = vpop.f32.mrb[4].mxu0 }
 0x252   :  { %v2360_v39 = vpop.f32.mrb[4].mxu1 }
 0x253   :  { %4282 = shalt.err (!%p4279_p2)  }
 0x254   :  { %s4283_s6 = scalar_lea.vmem %s198_s8, 1024  ;;  %p4288_p4 = scmp.lt.s32.totalorder %s198_s8, %s198_s8 }
 0x255   :  { %p4284_p3 = scmp.ne.s32.totalorder %s198_s8, %s4283_s6  ;;  %p4289_p5 = scmp.lt.s32.totalorder %s4283_s6, %s4283_s6 }
 0x257   :  { %p4290_p6 = por %p4289_p5, %p4288_p4 }
 0x259   :  { %p4291_p7 = pnand %p4290_p6, %p4284_p3 }
 0x25b   :  { %4294 = shalt.err (!%p4291_p7)  }
 0x25c   :  { %200 = dma.hbm_to_vmem [thread:$0]  %s4788_s9, 1024, %s198_s8, [#allocation6 + $0x2]  ;;  %v3614_v40 = vadd.f32 %v2360_v39, %v556_v32  ;;  %v2280_v41 = vpop.f32.mrb[5].mxu0  ;;  %v2362_v42 = vpop.f32.mrb[5].mxu1 }
 0x25d   :  { %v3613_v44 = vadd.f32 %v2280_v41, %v552_v33  ;;  %v3615_v45 = vadd.f32 %v2362_v42, %v560_v34  ;;  %v2282_v46 = vpop.f32.mrb[6].mxu0  ;;  %v2364_v47 = vpop.f32.mrb[6].mxu1  ;;  %s4295_s16 = scalar_lea.hbm %s4789_s10, 1024 }
 0x25e   :  { %p4296_p8 = scmp.ne.s32.totalorder %s4789_s10, %s4295_s16  ;;  %p4299_p9 = scmp.lt.u32.totalorder %s4295_s16, %s4789_s10 }
 0x260   :  { %p4301_p10 = pnand %p4299_p9, %p4296_p8 }
 0x262   :  { %4304 = shalt.err (!%p4301_p10)  }
 0x263   :  { %s4305_s9 = scalar_lea.vmem %s210_s4, 1024  ;;  %p4310_p12 = scmp.lt.s32.totalorder %s210_s4, %s210_s4 }
 0x264   :  { %p4306_p11 = scmp.ne.s32.totalorder %s210_s4, %s4305_s9  ;;  %p4311_p13 = scmp.lt.s32.totalorder %s4305_s9, %s4305_s9 }
 0x266   :  { %p4312_p0 = por %p4311_p13, %p4310_p12 }
 0x268   :  { %p4313_p1 = pnand %p4312_p0, %p4306_p11 }
 0x26a   :  { %4316 = shalt.err (!%p4313_p1)  }
 0x26b   :  { %212 = dma.hbm_to_vmem [thread:$0]  %s4789_s10, 1024, %s210_s4, [#allocation6 + $0x3]  ;;  %v2450_v48 = vmax.f32 %v3609_v35, 0.0  ;;  %v2455_v50 = vmax.f32 %v3614_v40, 0.0  ;;  %v2283_v51 = vpop.f32.mrb[7].mxu0  ;;  %v2365_v52 = vpop.f32.mrb[7].mxu1 }
 0x26c   :  { %v2449_v53 = vmax.f32 %v3608_v36, 0.0  ;;  %v2451_v54 = vmax.f32 %v3610_v37, 0.0  ;;  %v2454_v55 = vmax.f32 %v3613_v44, 0.0  ;;  %v2456_v56 = vmax.f32 %v3615_v45, 0.0  ;;  %v526_v20 = vld [vmem:[#allocation12 + $0x8] sm:$0x3] }
 0x26d   :  { %v2460_v57 = vmax.f32 %v2450_v48, %v2455_v50  ;;  %v543_v16 = vsub.s32 3, %v4593_v43  ;;  %v547_v62 = vsub.s32 4, %v4593_v43  ;;  %v564_v1 = vrot.slane %v526_v20, %v4657_v26 }
 0x26e   :  { %v4697_v58 = vmax.f32 %v2449_v53, %v2454_v55  ;;  %v4699_v59 = vmax.f32 %v2451_v54, %v2456_v56  ;;  %v568_v2 = vrot.slane %v526_v20, %v4652_v24 }
 0x26f   :  { %v544_v63 = vrot.slane %v4654_v25, %v543_v16  ;;  %v548_v0 = vrot.slane %v4654_v25, %v547_v62 }
 0x270   :  { %v2469_v61 = vcombine.low %v4697_v58, %v2460_v57 }
 0x271   :  { %v3611_v3 = vadd.f32 %v4646_v7, %v544_v63  ;;  %v3612_v4 = vadd.f32 %v2278_v38, %v548_v0 }
 0x272   :  { %v2477_v7 = vrot.slane %v2469_v61, %v4596_v49 }
 0x273   :  { %v2452_v12 = vmax.f32 %v3611_v3, 0.0  ;;  %v2453_v17 = vmax.f32 %v3612_v4, 0.0 }
 0x2c5   :  { %v2442_v5 = vpop.f32.mrb[8].mxu0 }
 0x2c6   :  { %v3616_v6 = vadd.f32 %v2442_v5, %v564_v1  ;;  %v2444_v8 = vpop.f32.mrb[9].mxu0 }
 0x2c7   :  { %v3617_v10 = vadd.f32 %v2444_v8, %v568_v2  ;;  %v2446_v11 = vpop.f32.mrb[10].mxu0 }
 0x2c8   :  { %v2457_v14 = vmax.f32 %v3616_v6, 0.0  ;;  %v2447_v15 = vpop.f32.mrb[11].mxu0 }
 0x2c9   :  { %v2458_v18 = vmax.f32 %v3617_v10, 0.0 }
 0x2ca   :  { %v4711_v19 = vmax.f32 %v2452_v12, %v2457_v14 }
 0x2cb   :  { %v4713_v21 = vmax.f32 %v2453_v17, %v2458_v18 }
 0x2cc   :  { %v2470_v22 = vcombine.low %v4699_v59, %v4711_v19 }
 0x2cd   :  { %3542 = vst.sshfl [vmem:[#allocation20 + $0x8] sm:$0x3 pattern:$0x76325410] %v4713_v21 }
 0x2ce   :  { %v2484_v9 = vrot.slane %v2470_v22, %v4596_v49 }
 0x2d0   :  { %v2485_v23 = vcombine.low %v2477_v7, %v2484_v9 }
 0x2d2   :  { %2495 = vst [vmem:[#allocation20] sm:$0xff] %v2485_v23 }
 0x2d3   :  { %4391 = dma.done.wait [#allocation6], 20480 }
 0x2d4   :  { %4392 = vsyncadd [#allocation6], 4294946816  ;;  %v2502_v25 = vpack.c.bf16 %v2460_v57, %v2460_v57  ;;  %v2507_v28 = vld [vmem:[#allocation2 + $0x8] sm:$0xff]  ;;  %v2509_v29 = vld [vmem:[#allocation2 + $0x18] sm:$0xff] }
 0x2d5   :  { %v2506_v60 = vld [vmem:[#allocation2] sm:$0xff]  ;;  %2688 = vmatprep.subr.bf16.mxu1 %v2507_v28  ;;  %2811 = vmatprep.subr.bf16.mxu0 %v2509_v29  ;;  %v2508_v30 = vld [vmem:[#allocation2 + $0x10] sm:$0xff]  ;;  %v2511_v13 = vld [vmem:[#allocation2 + $0x28] sm:$0xff] }
 0x2d6   :  { %2720 = vmatprep.mubr.bf16.mxu1 %v2502_v25  ;;  %2843 = vmatprep.mubr.bf16.mxu0 %v2502_v25  ;;  %v2513_v31 = vld [vmem:[#allocation2 + $0x38] sm:$0xff]  ;;  %v2510_v49 = vld [vmem:[#allocation2 + $0x20] sm:$0xff]  ;;  %v2512_v32 = vld [vmem:[#allocation2 + $0x30] sm:$0xff] }
 0x2d7   :  { %2689 = vmatpush1.bf16.msra.mxu1 %v2506_v60  ;;  %2812 = vmatpush1.bf16.msra.mxu0 %v2508_v30  ;;  %v2515_v33 = vld [vmem:[#allocation2 + $0x48] sm:$0xff]  ;;  %v2517_v34 = vld [vmem:[#allocation2 + $0x58] sm:$0xff]  ;;  %v2514_v35 = vld [vmem:[#allocation2 + $0x40] sm:$0xff] }
 0x2d8   :  { %2690 = vmatprep.subr.bf16.mxu1 %v2511_v13  ;;  %2813 = vmatprep.subr.bf16.mxu0 %v2513_v31  ;;  %v2516_v36 = vld [vmem:[#allocation2 + $0x50] sm:$0xff]  ;;  %v2519_v37 = vld [vmem:[#allocation2 + $0x68] sm:$0xff]  ;;  %v2521_v38 = vld [vmem:[#allocation2 + $0x78] sm:$0xff] }
 0x2d9   :  { %v2518_v39 = vld [vmem:[#allocation2 + $0x60] sm:$0xff]  ;;  %v2520_v40 = vld [vmem:[#allocation2 + $0x70] sm:$0xff]  ;;  %v2523_v41 = vld [vmem:[#allocation2 + $0x88] sm:$0xff] }
 0x2da   :  { %v2525_v42 = vld [vmem:[#allocation2 + $0x98] sm:$0xff]  ;;  %v2522_v44 = vld [vmem:[#allocation2 + $0x80] sm:$0xff]  ;;  %v2524_v45 = vld [vmem:[#allocation2 + $0x90] sm:$0xff] }
 0x2db   :  { %2691 = vmatpush1.bf16.msra.mxu1 %v2510_v49  ;;  %2814 = vmatpush1.bf16.msra.mxu0 %v2512_v32  ;;  %v2527_v46 = vld [vmem:[#allocation2 + $0xa8] sm:$0xff]  ;;  %v2529_v47 = vld [vmem:[#allocation2 + $0xb8] sm:$0xff]  ;;  %v2526_v48 = vld [vmem:[#allocation2 + $0xa0] sm:$0xff] }
 0x2dc   :  { %2692 = vmatprep.subr.bf16.mxu1 %v2515_v33  ;;  %2815 = vmatprep.subr.bf16.mxu0 %v2517_v34  ;;  %v2528_v50 = vld [vmem:[#allocation2 + $0xb0] sm:$0xff]  ;;  %v2531_v51 = vld [vmem:[#allocation2 + $0xc8] sm:$0xff]  ;;  %v2533_v52 = vld [vmem:[#allocation2 + $0xd8] sm:$0xff] }
 0x2dd   :  { %v2530_v53 = vld [vmem:[#allocation2 + $0xc0] sm:$0xff]  ;;  %v2532_v54 = vld [vmem:[#allocation2 + $0xd0] sm:$0xff]  ;;  %v2535_v55 = vld [vmem:[#allocation2 + $0xe8] sm:$0xff] }
 0x2de   :  { %v2537_v56 = vld [vmem:[#allocation2 + $0xf8] sm:$0xff]  ;;  %v2534_v57 = vld [vmem:[#allocation2 + $0xe0] sm:$0xff]  ;;  %v2536_v61 = vld [vmem:[#allocation2 + $0xf0] sm:$0xff] }
 0x2df   :  { %2693 = vmatpush1.bf16.msra.mxu1 %v2514_v35  ;;  %2816 = vmatpush1.bf16.msra.mxu0 %v2516_v36  ;;  %v2539_v62 = vld [vmem:[#allocation2 + $0x108] sm:$0xff]  ;;  %v2541_v20 = vld [vmem:[#allocation2 + $0x118] sm:$0xff]  ;;  %v2538_v63 = vld [vmem:[#allocation2 + $0x100] sm:$0xff]  ;;  %v2501_v36 = vpack.c.bf16 %v4697_v58, %v4697_v58 }
 0x2e0   :  { %2694 = vmatprep.subr.bf16.mxu1 %v2519_v37  ;;  %2817 = vmatprep.subr.bf16.mxu0 %v2521_v38  ;;  %v2540_v0 = vld [vmem:[#allocation2 + $0x110] sm:$0xff]  ;;  %v2543_v1 = vld [vmem:[#allocation2 + $0x128] sm:$0xff]  ;;  %v2545_v2 = vld [vmem:[#allocation2 + $0x138] sm:$0xff] }
 0x2e1   :  { %v2542_v3 = vld [vmem:[#allocation2 + $0x120] sm:$0xff]  ;;  %v2544_v4 = vld [vmem:[#allocation2 + $0x130] sm:$0xff]  ;;  %v2547_v5 = vld [vmem:[#allocation2 + $0x148] sm:$0xff] }
 0x2e2   :  { %v2549_v6 = vld [vmem:[#allocation2 + $0x158] sm:$0xff]  ;;  %v2546_v8 = vld [vmem:[#allocation2 + $0x140] sm:$0xff]  ;;  %v2548_v10 = vld [vmem:[#allocation2 + $0x150] sm:$0xff] }
 0x2e3   :  { %2695 = vmatpush1.bf16.msra.mxu1 %v2518_v39  ;;  %2818 = vmatpush1.bf16.msra.mxu0 %v2520_v40  ;;  %v2551_v11 = vld [vmem:[#allocation2 + $0x168] sm:$0xff]  ;;  %v2553_v12 = vld [vmem:[#allocation2 + $0x178] sm:$0xff]  ;;  %v2550_v14 = vld [vmem:[#allocation2 + $0x160] sm:$0xff] }
 0x2e4   :  { %2696 = vmatprep.subr.bf16.mxu1 %v2523_v41  ;;  %2819 = vmatprep.subr.bf16.mxu0 %v2525_v42  ;;  %v2552_v15 = vld [vmem:[#allocation2 + $0x170] sm:$0xff]  ;;  %v2555_v17 = vld [vmem:[#allocation2 + $0x188] sm:$0xff]  ;;  %v2557_v18 = vld [vmem:[#allocation2 + $0x198] sm:$0xff]  ;;  %v2504_v41 = vpack.c.bf16 %v4711_v19, %v4711_v19 }
 0x2e5   :  { %v2554_v22 = vld [vmem:[#allocation2 + $0x180] sm:$0xff]  ;;  %v2556_v7 = vld [vmem:[#allocation2 + $0x190] sm:$0xff]  ;;  %v2559_v9 = vld [vmem:[#allocation2 + $0x1a8] sm:$0xff] }
 0x2e6   :  { %v2561_v23 = vld [vmem:[#allocation2 + $0x1b8] sm:$0xff]  ;;  %v2558_v25 = vld [vmem:[#allocation2 + $0x1a0] sm:$0xff]  ;;  %v2560_v28 = vld [vmem:[#allocation2 + $0x1b0] sm:$0xff] }
 0x2e7   :  { %2697 = vmatpush1.bf16.msra.mxu1 %v2522_v44  ;;  %2820 = vmatpush1.bf16.msra.mxu0 %v2524_v45  ;;  %v2563_v29 = vld [vmem:[#allocation2 + $0x1c8] sm:$0xff]  ;;  %v2565_v60 = vld [vmem:[#allocation2 + $0x1d8] sm:$0xff]  ;;  %v2562_v30 = vld [vmem:[#allocation2 + $0x1c0] sm:$0xff] }
 0x2e8   :  { %2698 = vmatprep.subr.bf16.mxu1 %v2527_v46  ;;  %2821 = vmatprep.subr.bf16.mxu0 %v2529_v47  ;;  %v2564_v13 = vld [vmem:[#allocation2 + $0x1d0] sm:$0xff]  ;;  %v2567_v31 = vld [vmem:[#allocation2 + $0x1e8] sm:$0xff]  ;;  %v2569_v49 = vld [vmem:[#allocation2 + $0x1f8] sm:$0xff] }
 0x2e9   :  { %v2566_v32 = vld [vmem:[#allocation2 + $0x1e0] sm:$0xff]  ;;  %v2568_v33 = vld [vmem:[#allocation2 + $0x1f0] sm:$0xff]  ;;  %v2571_v34 = vld [vmem:[#allocation2 + $0x208] sm:$0xff] }
 0x2ea   :  { %v2573_v35 = vld [vmem:[#allocation2 + $0x218] sm:$0xff]  ;;  %v2570_v37 = vld [vmem:[#allocation2 + $0x200] sm:$0xff]  ;;  %v2572_v38 = vld [vmem:[#allocation2 + $0x210] sm:$0xff] }
 0x2eb   :  { %2699 = vmatpush1.bf16.msra.mxu1 %v2526_v48  ;;  %2822 = vmatpush1.bf16.msra.mxu0 %v2528_v50  ;;  %v2575_v39 = vld [vmem:[#allocation2 + $0x228] sm:$0xff]  ;;  %v2577_v40 = vld [vmem:[#allocation2 + $0x238] sm:$0xff]  ;;  %v2574_v42 = vld [vmem:[#allocation2 + $0x220] sm:$0xff] }
 0x2ec   :  { %2700 = vmatprep.subr.bf16.mxu1 %v2531_v51  ;;  %2823 = vmatprep.subr.bf16.mxu0 %v2533_v52  ;;  %v2576_v44 = vld [vmem:[#allocation2 + $0x230] sm:$0xff]  ;;  %v2579_v58 = vld [vmem:[#allocation2 + $0x248] sm:$0xff]  ;;  %v2581_v45 = vld [vmem:[#allocation2 + $0x258] sm:$0xff] }
 0x2ed   :  { %v2578_v46 = vld [vmem:[#allocation2 + $0x240] sm:$0xff]  ;;  %v2580_v47 = vld [vmem:[#allocation2 + $0x250] sm:$0xff]  ;;  %v2583_v48 = vld [vmem:[#allocation2 + $0x268] sm:$0xff] }
 0x2ee   :  { %v2585_v19 = vld [vmem:[#allocation2 + $0x278] sm:$0xff]  ;;  %v2582_v50 = vld [vmem:[#allocation2 + $0x260] sm:$0xff]  ;;  %v2584_v51 = vld [vmem:[#allocation2 + $0x270] sm:$0xff] }
 0x2ef   :  { %2701 = vmatpush1.bf16.msra.mxu1 %v2530_v53  ;;  %2824 = vmatpush1.bf16.msra.mxu0 %v2532_v54  ;;  %v2587_v52 = vld [vmem:[#allocation2 + $0x288] sm:$0xff]  ;;  %v2589_v53 = vld [vmem:[#allocation2 + $0x298] sm:$0xff]  ;;  %v2586_v54 = vld [vmem:[#allocation2 + $0x280] sm:$0xff] }
 0x2f0   :  { %2702 = vmatprep.subr.bf16.mxu1 %v2535_v55  ;;  %2825 = vmatprep.subr.bf16.mxu0 %v2537_v56  ;;  %v2588_v55 = vld [vmem:[#allocation2 + $0x290] sm:$0xff]  ;;  %v2591_v56 = vld [vmem:[#allocation2 + $0x2a8] sm:$0xff] }
 0x2f3   :  { %2703 = vmatpush1.bf16.msra.mxu1 %v2534_v57  ;;  %2826 = vmatpush1.bf16.msra.mxu0 %v2536_v61  ;;  %v2593_v57 = vld [vmem:[#allocation2 + $0x2b8] sm:$0xff]  ;;  %v2590_v61 = vld [vmem:[#allocation2 + $0x2a0] sm:$0xff] }
 0x2f4   :  { %2704 = vmatprep.subr.bf16.mxu1 %v2539_v62  ;;  %2827 = vmatprep.subr.bf16.mxu0 %v2541_v20  ;;  %v2592_v62 = vld [vmem:[#allocation2 + $0x2b0] sm:$0xff]  ;;  %v2595_v20 = vld [vmem:[#allocation2 + $0x2c8] sm:$0xff] }
 0x2f7   :  { %2705 = vmatpush1.bf16.msra.mxu1 %v2538_v63  ;;  %2828 = vmatpush1.bf16.msra.mxu0 %v2540_v0  ;;  %v2597_v63 = vld [vmem:[#allocation2 + $0x2d8] sm:$0xff]  ;;  %v2594_v0 = vld [vmem:[#allocation2 + $0x2c0] sm:$0xff] }
 0x2f8   :  { %2706 = vmatprep.subr.bf16.mxu1 %v2543_v1  ;;  %2829 = vmatprep.subr.bf16.mxu0 %v2545_v2  ;;  %v2596_v1 = vld [vmem:[#allocation2 + $0x2d0] sm:$0xff]  ;;  %v2599_v2 = vld [vmem:[#allocation2 + $0x2e8] sm:$0xff] }
 0x2fb   :  { %2707 = vmatpush1.bf16.msra.mxu1 %v2542_v3  ;;  %2830 = vmatpush1.bf16.msra.mxu0 %v2544_v4  ;;  %v2601_v3 = vld [vmem:[#allocation2 + $0x2f8] sm:$0xff]  ;;  %v2598_v4 = vld [vmem:[#allocation2 + $0x2e0] sm:$0xff] }
 0x2fc   :  { %2708 = vmatprep.subr.bf16.mxu1 %v2547_v5  ;;  %2831 = vmatprep.subr.bf16.mxu0 %v2549_v6  ;;  %v2600_v5 = vld [vmem:[#allocation2 + $0x2f0] sm:$0xff]  ;;  %v2603_v6 = vld [vmem:[#allocation2 + $0x308] sm:$0xff] }
 0x2ff   :  { %2709 = vmatpush1.bf16.msra.mxu1 %v2546_v8  ;;  %2832 = vmatpush1.bf16.msra.mxu0 %v2548_v10  ;;  %v2605_v8 = vld [vmem:[#allocation2 + $0x318] sm:$0xff]  ;;  %v2602_v10 = vld [vmem:[#allocation2 + $0x300] sm:$0xff] }
 0x300   :  { %2710 = vmatprep.subr.bf16.mxu1 %v2551_v11  ;;  %2833 = vmatprep.subr.bf16.mxu0 %v2553_v12  ;;  %v2604_v11 = vld [vmem:[#allocation2 + $0x310] sm:$0xff]  ;;  %v2607_v12 = vld [vmem:[#allocation2 + $0x328] sm:$0xff] }
 0x303   :  { %2711 = vmatpush1.bf16.msra.mxu1 %v2550_v14  ;;  %2834 = vmatpush1.bf16.msra.mxu0 %v2552_v15  ;;  %v2609_v14 = vld [vmem:[#allocation2 + $0x338] sm:$0xff]  ;;  %v2606_v15 = vld [vmem:[#allocation2 + $0x320] sm:$0xff] }
 0x304   :  { %2712 = vmatprep.subr.bf16.mxu1 %v2555_v17  ;;  %2835 = vmatprep.subr.bf16.mxu0 %v2557_v18  ;;  %v2608_v17 = vld [vmem:[#allocation2 + $0x330] sm:$0xff]  ;;  %v2611_v18 = vld [vmem:[#allocation2 + $0x348] sm:$0xff] }
 0x307   :  { %2713 = vmatpush1.bf16.msra.mxu1 %v2554_v22  ;;  %2836 = vmatpush1.bf16.msra.mxu0 %v2556_v7  ;;  %v2613_v22 = vld [vmem:[#allocation2 + $0x358] sm:$0xff]  ;;  %v2610_v7 = vld [vmem:[#allocation2 + $0x340] sm:$0xff] }
 0x308   :  { %2714 = vmatprep.subr.bf16.mxu1 %v2559_v9  ;;  %2837 = vmatprep.subr.bf16.mxu0 %v2561_v23  ;;  %v2612_v9 = vld [vmem:[#allocation2 + $0x350] sm:$0xff]  ;;  %v2615_v23 = vld [vmem:[#allocation2 + $0x368] sm:$0xff] }
 0x30b   :  { %2715 = vmatpush1.bf16.msra.mxu1 %v2558_v25  ;;  %2838 = vmatpush1.bf16.msra.mxu0 %v2560_v28  ;;  %v2617_v25 = vld [vmem:[#allocation2 + $0x378] sm:$0xff]  ;;  %v2614_v28 = vld [vmem:[#allocation2 + $0x360] sm:$0xff] }
 0x30c   :  { %2716 = vmatprep.subr.bf16.mxu1 %v2563_v29  ;;  %2839 = vmatprep.subr.bf16.mxu0 %v2565_v60  ;;  %v2616_v29 = vld [vmem:[#allocation2 + $0x370] sm:$0xff]  ;;  %v2619_v60 = vld [vmem:[#allocation2 + $0x388] sm:$0xff] }
 0x30f   :  { %2717 = vmatpush1.bf16.msra.mxu1 %v2562_v30  ;;  %2840 = vmatpush1.bf16.msra.mxu0 %v2564_v13  ;;  %v2621_v30 = vld [vmem:[#allocation2 + $0x398] sm:$0xff]  ;;  %v2618_v13 = vld [vmem:[#allocation2 + $0x380] sm:$0xff] }
 0x310   :  { %2718 = vmatprep.subr.bf16.mxu1 %v2567_v31  ;;  %2841 = vmatprep.subr.bf16.mxu0 %v2569_v49  ;;  %v2620_v31 = vld [vmem:[#allocation2 + $0x390] sm:$0xff]  ;;  %v2623_v49 = vld [vmem:[#allocation2 + $0x3a8] sm:$0xff] }
 0x313   :  { %2719 = vmatpush1.bf16.msra.mxu1 %v2566_v32  ;;  %2842 = vmatpush1.bf16.msra.mxu0 %v2568_v33  ;;  %v2625_v32 = vld [vmem:[#allocation2 + $0x3b8] sm:$0xff]  ;;  %v2622_v33 = vld [vmem:[#allocation2 + $0x3a0] sm:$0xff] }
 0x314   :  { %2729 = vmatprep.subr.bf16.mxu1 %v2571_v34  ;;  %2852 = vmatprep.subr.bf16.mxu0 %v2573_v35  ;;  %v2624_v34 = vld [vmem:[#allocation2 + $0x3b0] sm:$0xff]  ;;  %v2627_v35 = vld [vmem:[#allocation2 + $0x3c8] sm:$0xff] }
 0x316   :  { %2721 = vmatmul.mubr.bf16.vlgmr.msra.gmra.mrb[8].mxu1 %v2501_v36  ;;  %2844 = vmatmul.mubr.bf16.vlgmr.msra.gmra.mrb[12].mxu0 %v2501_v36  ;;  %v2629_v36 = vld [vmem:[#allocation2 + $0x3d8] sm:$0xff] }
 0x317   :  { %2730 = vmatpush1.bf16.msra.mxu1 %v2570_v37  ;;  %2853 = vmatpush1.bf16.msra.mxu0 %v2572_v38  ;;  %v2626_v37 = vld [vmem:[#allocation2 + $0x3c0] sm:$0xff]  ;;  %v2628_v38 = vld [vmem:[#allocation2 + $0x3d0] sm:$0xff] }
 0x318   :  { %2731 = vmatprep.subr.bf16.mxu1 %v2575_v39  ;;  %2854 = vmatprep.subr.bf16.mxu0 %v2577_v40  ;;  %v2631_v39 = vld [vmem:[#allocation2 + $0x3e8] sm:$0xff]  ;;  %v2633_v40 = vld [vmem:[#allocation2 + $0x3f8] sm:$0xff] }
 0x319   :  { %2761 = vmatprep.mubr.bf16.mxu1 %v2504_v41  ;;  %2884 = vmatprep.mubr.bf16.mxu0 %v2504_v41  ;;  %v2630_v41 = vld [vmem:[#allocation2 + $0x3e0] sm:$0xff] }
 0x31b   :  { %2732 = vmatpush1.bf16.msra.mxu1 %v2574_v42  ;;  %2855 = vmatpush1.bf16.msra.mxu0 %v2576_v44  ;;  %v2632_v42 = vld [vmem:[#allocation2 + $0x3f0] sm:$0xff]  ;;  %v2635_v44 = vld [vmem:[#allocation2 + $0x408] sm:$0xff] }
 0x31c   :  { %2733 = vmatprep.subr.bf16.mxu1 %v2579_v58  ;;  %2856 = vmatprep.subr.bf16.mxu0 %v2581_v45  ;;  %v2637_v58 = vld [vmem:[#allocation2 + $0x418] sm:$0xff]  ;;  %v2503_v45 = vpack.c.bf16 %v4699_v59, %v4699_v59  ;;  %v2642_v59 = vld [vmem:[#allocation2 + $0x440] sm:$0xff] }
 0x31f   :  { %2734 = vmatpush1.bf16.msra.mxu1 %v2578_v46  ;;  %2857 = vmatpush1.bf16.msra.mxu0 %v2580_v47  ;;  %v2634_v46 = vld [vmem:[#allocation2 + $0x400] sm:$0xff]  ;;  %v2636_v47 = vld [vmem:[#allocation2 + $0x410] sm:$0xff] }
 0x320   :  { %2735 = vmatprep.subr.bf16.mxu1 %v2583_v48  ;;  %2858 = vmatprep.subr.bf16.mxu0 %v2585_v19  ;;  %v2639_v48 = vld [vmem:[#allocation2 + $0x428] sm:$0xff]  ;;  %v2641_v19 = vld [vmem:[#allocation2 + $0x438] sm:$0xff] }
 0x323   :  { %2736 = vmatpush1.bf16.msra.mxu1 %v2582_v50  ;;  %2859 = vmatpush1.bf16.msra.mxu0 %v2584_v51  ;;  %v2638_v50 = vld [vmem:[#allocation2 + $0x420] sm:$0xff]  ;;  %v2640_v51 = vld [vmem:[#allocation2 + $0x430] sm:$0xff] }
 0x324   :  { %2737 = vmatprep.subr.bf16.mxu1 %v2587_v52  ;;  %2860 = vmatprep.subr.bf16.mxu0 %v2589_v53  ;;  %v2643_v52 = vld [vmem:[#allocation2 + $0x448] sm:$0xff]  ;;  %v2645_v53 = vld [vmem:[#allocation2 + $0x458] sm:$0xff] }
 0x327   :  { %2738 = vmatpush1.bf16.msra.mxu1 %v2586_v54  ;;  %2861 = vmatpush1.bf16.msra.mxu0 %v2588_v55  ;;  %v4427_v54 = vmov 0   ;;  %v2644_v55 = vld [vmem:[#allocation2 + $0x450] sm:$0xff] }
 0x328   :  { %2739 = vmatprep.subr.bf16.mxu1 %v2591_v56  ;;  %2862 = vmatprep.subr.bf16.mxu0 %v2593_v57  ;;  %v2647_v56 = vld [vmem:[#allocation2 + $0x468] sm:$0xff]  ;;  %v2649_v57 = vld [vmem:[#allocation2 + $0x478] sm:$0xff] }
 0x32b   :  { %2740 = vmatpush1.bf16.msra.mxu1 %v2590_v61  ;;  %2863 = vmatpush1.bf16.msra.mxu0 %v2592_v62  ;;  %v2646_v61 = vld [vmem:[#allocation2 + $0x460] sm:$0xff]  ;;  %v2648_v62 = vld [vmem:[#allocation2 + $0x470] sm:$0xff] }
 0x32c   :  { %2741 = vmatprep.subr.bf16.mxu1 %v2595_v20  ;;  %2864 = vmatprep.subr.bf16.mxu0 %v2597_v63  ;;  %v2651_v20 = vld [vmem:[#allocation2 + $0x488] sm:$0xff]  ;;  %v2653_v63 = vld [vmem:[#allocation2 + $0x498] sm:$0xff] }
 0x32f   :  { %2742 = vmatpush1.bf16.msra.mxu1 %v2594_v0  ;;  %2865 = vmatpush1.bf16.msra.mxu0 %v2596_v1  ;;  %v2650_v0 = vld [vmem:[#allocation2 + $0x480] sm:$0xff]  ;;  %v2652_v1 = vld [vmem:[#allocation2 + $0x490] sm:$0xff] }
 0x330   :  { %2743 = vmatprep.subr.bf16.mxu1 %v2599_v2  ;;  %2866 = vmatprep.subr.bf16.mxu0 %v2601_v3  ;;  %v2655_v2 = vld [vmem:[#allocation2 + $0x4a8] sm:$0xff]  ;;  %v2657_v3 = vld [vmem:[#allocation2 + $0x4b8] sm:$0xff] }
 0x333   :  { %2744 = vmatpush1.bf16.msra.mxu1 %v2598_v4  ;;  %2867 = vmatpush1.bf16.msra.mxu0 %v2600_v5  ;;  %v2654_v4 = vld [vmem:[#allocation2 + $0x4a0] sm:$0xff]  ;;  %v2656_v5 = vld [vmem:[#allocation2 + $0x4b0] sm:$0xff] }
 0x334   :  { %2745 = vmatprep.subr.bf16.mxu1 %v2603_v6  ;;  %2868 = vmatprep.subr.bf16.mxu0 %v2605_v8  ;;  %v2659_v6 = vld [vmem:[#allocation2 + $0x4c8] sm:$0xff]  ;;  %v2661_v8 = vld [vmem:[#allocation2 + $0x4d8] sm:$0xff] }
 0x337   :  { %2746 = vmatpush1.bf16.msra.mxu1 %v2602_v10  ;;  %2869 = vmatpush1.bf16.msra.mxu0 %v2604_v11  ;;  %v2658_v10 = vld [vmem:[#allocation2 + $0x4c0] sm:$0xff]  ;;  %v2660_v11 = vld [vmem:[#allocation2 + $0x4d0] sm:$0xff] }
 0x338   :  { %2747 = vmatprep.subr.bf16.mxu1 %v2607_v12  ;;  %2870 = vmatprep.subr.bf16.mxu0 %v2609_v14  ;;  %v2663_v12 = vld [vmem:[#allocation2 + $0x4e8] sm:$0xff]  ;;  %v2665_v14 = vld [vmem:[#allocation2 + $0x4f8] sm:$0xff] }
 0x33b   :  { %2748 = vmatpush1.bf16.msra.mxu1 %v2606_v15  ;;  %2871 = vmatpush1.bf16.msra.mxu0 %v2608_v17  ;;  %v2662_v15 = vld [vmem:[#allocation2 + $0x4e0] sm:$0xff]  ;;  %v2664_v17 = vld [vmem:[#allocation2 + $0x4f0] sm:$0xff] }
 0x33c   :  { %2749 = vmatprep.subr.bf16.mxu1 %v2611_v18  ;;  %2872 = vmatprep.subr.bf16.mxu0 %v2613_v22  ;;  %v2505_v18 = vpack.c.bf16 %v4713_v21, %v4713_v21  ;;  %v2666_v22 = vld [vmem:[#allocation13] sm:$0xf] }
 0x33f   :  { %2750 = vmatpush1.bf16.msra.mxu1 %v2610_v7  ;;  %2873 = vmatpush1.bf16.msra.mxu0 %v2612_v9  ;;  %v2671_v7 = vrot.slane %v2666_v22, %v4657_v26  ;;  %v2679_v9 = vrot.slane %v2666_v22, %v539_v27 }
 0x340   :  { %2751 = vmatprep.subr.bf16.mxu1 %v2615_v23  ;;  %2874 = vmatprep.subr.bf16.mxu0 %v2617_v25  ;;  %v2675_v23 = vrot.slane %v2666_v22, %v4652_v24  ;;  %v2683_v25 = vrot.slane %v2666_v22, %v543_v16 }
 0x343   :  { %2752 = vmatpush1.bf16.msra.mxu1 %v2614_v28  ;;  %2875 = vmatpush1.bf16.msra.mxu0 %v2616_v29 }
 0x344   :  { %2753 = vmatprep.subr.bf16.mxu1 %v2619_v60  ;;  %2876 = vmatprep.subr.bf16.mxu0 %v2621_v30 }
 0x347   :  { %2754 = vmatpush1.bf16.msra.mxu1 %v2618_v13  ;;  %2877 = vmatpush1.bf16.msra.mxu0 %v2620_v31 }
 0x348   :  { %2755 = vmatprep.subr.bf16.mxu1 %v2623_v49  ;;  %2878 = vmatprep.subr.bf16.mxu0 %v2625_v32 }
 0x34b   :  { %2756 = vmatpush1.bf16.msra.mxu1 %v2622_v33  ;;  %2879 = vmatpush1.bf16.msra.mxu0 %v2624_v34 }
 0x34c   :  { %2757 = vmatprep.subr.bf16.mxu1 %v2627_v35  ;;  %2880 = vmatprep.subr.bf16.mxu0 %v2629_v36 }
 0x34f   :  { %2758 = vmatpush1.bf16.msra.mxu1 %v2626_v37  ;;  %2881 = vmatpush1.bf16.msra.mxu0 %v2628_v38 }
 0x350   :  { %2759 = vmatprep.subr.bf16.mxu1 %v2631_v39  ;;  %2882 = vmatprep.subr.bf16.mxu0 %v2633_v40 }
 0x353   :  { %2760 = vmatpush1.bf16.msra.mxu1 %v2630_v41  ;;  %2883 = vmatpush1.bf16.msra.mxu0 %v2632_v42 }
 0x354   :  { %2770 = vmatprep.subr.bf16.mxu1 %v2635_v44  ;;  %2893 = vmatprep.subr.bf16.mxu0 %v2637_v58 }
 0x356   :  { %2762 = vmatmul.mubr.bf16.vlgmr.msra.gmra.mrb[8].mxu1 %v2503_v45  ;;  %2885 = vmatmul.mubr.bf16.vlgmr.msra.gmra.mrb[12].mxu0 %v2503_v45 }
 0x357   :  { %2771 = vmatpush1.bf16.msra.mxu1 %v2634_v46  ;;  %2894 = vmatpush1.bf16.msra.mxu0 %v2636_v47 }
 0x358   :  { %2772 = vmatprep.subr.bf16.mxu1 %v2639_v48  ;;  %2895 = vmatprep.subr.bf16.mxu0 %v2641_v19 }
 0x359   :  { %2802 = vmatprep.mubr.bf16.mxu1 %v4427_v54  ;;  %2925 = vmatprep.mubr.bf16.mxu0 %v4427_v54 }
 0x35b   :  { %2773 = vmatpush1.bf16.msra.mxu1 %v2638_v50  ;;  %2896 = vmatpush1.bf16.msra.mxu0 %v2640_v51 }
 0x35c   :  { %2774 = vmatprep.subr.bf16.mxu1 %v2643_v52  ;;  %2897 = vmatprep.subr.bf16.mxu0 %v2645_v53 }
 0x35f   :  { %2775 = vmatpush1.bf16.msra.mxu1 %v2642_v59  ;;  %2898 = vmatpush1.bf16.msra.mxu0 %v2644_v55 }
 0x360   :  { %2776 = vmatprep.subr.bf16.mxu1 %v2647_v56  ;;  %2899 = vmatprep.subr.bf16.mxu0 %v2649_v57 }
 0x363   :  { %2777 = vmatpush1.bf16.msra.mxu1 %v2646_v61  ;;  %2900 = vmatpush1.bf16.msra.mxu0 %v2648_v62 }
 0x364   :  { %2778 = vmatprep.subr.bf16.mxu1 %v2651_v20  ;;  %2901 = vmatprep.subr.bf16.mxu0 %v2653_v63 }
 0x367   :  { %2779 = vmatpush1.bf16.msra.mxu1 %v2650_v0  ;;  %2902 = vmatpush1.bf16.msra.mxu0 %v2652_v1 }
 0x368   :  { %2780 = vmatprep.subr.bf16.mxu1 %v2655_v2  ;;  %2903 = vmatprep.subr.bf16.mxu0 %v2657_v3 }
 0x36b   :  { %2781 = vmatpush1.bf16.msra.mxu1 %v2654_v4  ;;  %2904 = vmatpush1.bf16.msra.mxu0 %v2656_v5 }
 0x36c   :  { %2782 = vmatprep.subr.bf16.mxu1 %v2659_v6  ;;  %2905 = vmatprep.subr.bf16.mxu0 %v2661_v8 }
 0x36f   :  { %2783 = vmatpush1.bf16.msra.mxu1 %v2658_v10  ;;  %2906 = vmatpush1.bf16.msra.mxu0 %v2660_v11 }
 0x370   :  { %2784 = vmatprep.subr.bf16.mxu1 %v2663_v12  ;;  %2907 = vmatprep.subr.bf16.mxu0 %v2665_v14 }
 0x373   :  { %2785 = vmatpush1.bf16.msra.mxu1 %v2662_v15  ;;  %2908 = vmatpush1.bf16.msra.mxu0 %v2664_v17 }
 0x376   :  { %2803 = vmatmul.mubr.bf16.vlgmr.msra.gmra.mrb[8].mxu1 %v2505_v18  ;;  %2926 = vmatmul.mubr.bf16.vlgmr.msra.gmra.mrb[12].mxu0 %v2505_v18 }
 0x449   :  { %v2804_v28 = vpop.f32.mrb[8].mxu1  ;;  %v2927_v29 = vpop.f32.mrb[12].mxu0 }
 0x44a   :  { %v3618_v60 = vadd.f32 %v2804_v28, %v2671_v7  ;;  %v3620_v30 = vadd.f32 %v2927_v29, %v2679_v9  ;;  %v2806_v21 = vpop.f32.mrb[9].mxu1  ;;  %v2929_v13 = vpop.f32.mrb[13].mxu0 }
 0x44b   :  { %v3619_v31 = vadd.f32 %v2806_v21, %v2675_v23  ;;  %v3621_v49 = vadd.f32 %v2929_v13, %v2683_v25  ;;  %v2808_v32 = vpop.f32.mrb[10].mxu1  ;;  %v2931_v33 = vpop.f32.mrb[14].mxu0 }
 0x44c   :  { %v2934_v34 = vmax.f32 %v3618_v60, 0.0  ;;  %v2936_v35 = vmax.f32 %v3620_v30, 0.0  ;;  %v2809_v36 = vpop.f32.mrb[11].mxu1  ;;  %v2932_v37 = vpop.f32.mrb[15].mxu0 }
 0x44d   :  { %v2935_v27 = vmax.f32 %v3619_v31, 0.0  ;;  %v2937_v38 = vmax.f32 %v3621_v49, 0.0 }
 0x44e   :  { %v4734_v39 = vmax.f32 %v2934_v34, %v2936_v35 }
 0x44f   :  { %v2939_v43 = vmax.f32 %v2935_v27, %v2937_v38 }
 0x451   :  { %v2942_v16 = vcombine.low %v4734_v39, %v2939_v43 }
 0x453   :  { %3543 = vst.sshfl [vmem:[#allocation22] sm:$0x33 pattern:$0x76325410] %v2942_v16 }
 0x454   :  { %4393 = dma.done.wait [#allocation6 + $0x1], 4096 }
 0x455   :  { %4394 = vsyncadd [#allocation6 + $0x1], 4294963200  ;;  %v2957_v40 = vpack.c.bf16 %v2939_v43, %v2939_v43  ;;  %v2959_v41 = vld [vmem:[#allocation3 + $0x8] sm:$0xff]  ;;  %v2958_v42 = vld [vmem:[#allocation3] sm:$0xff]  ;;  %v2956_v12 = vpack.c.bf16 %v4734_v39, %v4734_v39 }
 0x456   :  { %v2961_v44 = vld [vmem:[#allocation3 + $0x18] sm:$0xff]  ;;  %3002 = vmatprep.subr.bf16.mxu1 %v2959_v41  ;;  %v2960_v58 = vld [vmem:[#allocation3 + $0x10] sm:$0xff]  ;;  %v2963_v45 = vld [vmem:[#allocation3 + $0x28] sm:$0xff] }
 0x457   :  { %3034 = vmatprep.mubr.bf16.mxu1 %v2957_v40  ;;  %3003 = vmatpush1.bf16.msra.mxu1 %v2958_v42  ;;  %v2962_v46 = vld [vmem:[#allocation3 + $0x20] sm:$0xff]  ;;  %v2965_v47 = vld [vmem:[#allocation3 + $0x38] sm:$0xff]  ;;  %v2964_v48 = vld [vmem:[#allocation3 + $0x30] sm:$0xff] }
 0x458   :  { %3004 = vmatprep.subr.bf16.mxu1 %v2961_v44  ;;  %v2967_v19 = vld [vmem:[#allocation3 + $0x48] sm:$0xff]  ;;  %v2966_v50 = vld [vmem:[#allocation3 + $0x40] sm:$0xff]  ;;  %v2969_v51 = vld [vmem:[#allocation3 + $0x58] sm:$0xff] }
 0x459   :  { %v2968_v52 = vld [vmem:[#allocation3 + $0x50] sm:$0xff]  ;;  %v2971_v53 = vld [vmem:[#allocation3 + $0x68] sm:$0xff]  ;;  %v2970_v54 = vld [vmem:[#allocation3 + $0x60] sm:$0xff] }
 0x45a   :  { %v2973_v59 = vld [vmem:[#allocation3 + $0x78] sm:$0xff]  ;;  %v2972_v55 = vld [vmem:[#allocation3 + $0x70] sm:$0xff]  ;;  %v2975_v56 = vld [vmem:[#allocation3 + $0x88] sm:$0xff] }
 0x45b   :  { %3005 = vmatpush1.bf16.msra.mxu1 %v2960_v58  ;;  %v2974_v57 = vld [vmem:[#allocation3 + $0x80] sm:$0xff]  ;;  %v2977_v61 = vld [vmem:[#allocation3 + $0x98] sm:$0xff]  ;;  %v2976_v62 = vld [vmem:[#allocation3 + $0x90] sm:$0xff] }
 0x45c   :  { %3006 = vmatprep.subr.bf16.mxu1 %v2963_v45  ;;  %v2979_v20 = vld [vmem:[#allocation3 + $0xa8] sm:$0xff]  ;;  %v2978_v63 = vld [vmem:[#allocation3 + $0xa0] sm:$0xff]  ;;  %v2981_v0 = vld [vmem:[#allocation3 + $0xb8] sm:$0xff] }
 0x45d   :  { %v2980_v1 = vld [vmem:[#allocation3 + $0xb0] sm:$0xff]  ;;  %v2983_v2 = vld [vmem:[#allocation3 + $0xc8] sm:$0xff]  ;;  %v2982_v3 = vld [vmem:[#allocation3 + $0xc0] sm:$0xff] }
 0x45e   :  { %v2985_v4 = vld [vmem:[#allocation3 + $0xd8] sm:$0xff]  ;;  %v2984_v5 = vld [vmem:[#allocation3 + $0xd0] sm:$0xff]  ;;  %v2987_v6 = vld [vmem:[#allocation3 + $0xe8] sm:$0xff] }
 0x45f   :  { %3007 = vmatpush1.bf16.msra.mxu1 %v2962_v46  ;;  %v2986_v8 = vld [vmem:[#allocation3 + $0xe0] sm:$0xff]  ;;  %v2989_v10 = vld [vmem:[#allocation3 + $0xf8] sm:$0xff]  ;;  %v2988_v11 = vld [vmem:[#allocation3 + $0xf0] sm:$0xff] }
 0x460   :  { %3008 = vmatprep.subr.bf16.mxu1 %v2965_v47  ;;  %v2990_v14 = vld [vmem:[#allocation15] sm:$0x3] }
 0x461   :  { %v2995_v15 = vrot.slane %v2990_v14, %v4657_v26  ;;  %v2999_v17 = vrot.slane %v2990_v14, %v4652_v24 }
 0x463   :  { %3009 = vmatpush1.bf16.msra.mxu1 %v2964_v48 }
 0x464   :  { %3010 = vmatprep.subr.bf16.mxu1 %v2967_v19 }
 0x467   :  { %3011 = vmatpush1.bf16.msra.mxu1 %v2966_v50 }
 0x468   :  { %3012 = vmatprep.subr.bf16.mxu1 %v2969_v51 }
 0x46b   :  { %3013 = vmatpush1.bf16.msra.mxu1 %v2968_v52 }
 0x46c   :  { %3014 = vmatprep.subr.bf16.mxu1 %v2971_v53 }
 0x46f   :  { %3015 = vmatpush1.bf16.msra.mxu1 %v2970_v54 }
 0x470   :  { %3016 = vmatprep.subr.bf16.mxu1 %v2973_v59 }
 0x473   :  { %3017 = vmatpush1.bf16.msra.mxu1 %v2972_v55 }
 0x474   :  { %3018 = vmatprep.subr.bf16.mxu1 %v2975_v56 }
 0x477   :  { %3019 = vmatpush1.bf16.msra.mxu1 %v2974_v57 }
 0x478   :  { %3020 = vmatprep.subr.bf16.mxu1 %v2977_v61 }
 0x47b   :  { %3021 = vmatpush1.bf16.msra.mxu1 %v2976_v62 }
 0x47c   :  { %3022 = vmatprep.subr.bf16.mxu1 %v2979_v20 }
 0x47f   :  { %3023 = vmatpush1.bf16.msra.mxu1 %v2978_v63 }
 0x480   :  { %3024 = vmatprep.subr.bf16.mxu1 %v2981_v0 }
 0x483   :  { %3025 = vmatpush1.bf16.msra.mxu1 %v2980_v1 }
 0x484   :  { %3026 = vmatprep.subr.bf16.mxu1 %v2983_v2 }
 0x487   :  { %3027 = vmatpush1.bf16.msra.mxu1 %v2982_v3 }
 0x488   :  { %3028 = vmatprep.subr.bf16.mxu1 %v2985_v4 }
 0x48b   :  { %3029 = vmatpush1.bf16.msra.mxu1 %v2984_v5 }
 0x48c   :  { %3030 = vmatprep.subr.bf16.mxu1 %v2987_v6 }
 0x48f   :  { %3031 = vmatpush1.bf16.msra.mxu1 %v2986_v8 }
 0x490   :  { %3032 = vmatprep.subr.bf16.mxu1 %v2989_v10 }
 0x493   :  { %3033 = vmatpush1.bf16.msra.mxu1 %v2988_v11 }
 0x496   :  { %3035 = vmatmul.mubr.bf16.vlgmr.msra.gmra.mrb[12].mxu1 %v2956_v12 }
 0x569   :  { %v3036_v18 = vpop.f32.mrb[12].mxu1 }
 0x56a   :  { %v3037_v22 = vadd.f32 %v3036_v18, %v2995_v15  ;;  %v3038_v7 = vpop.f32.mrb[13].mxu1 }
 0x56b   :  { %v3039_v9 = vadd.f32 %v3038_v7, %v2999_v17  ;;  %v3040_v23 = vpop.f32.mrb[14].mxu1 }
 0x56c   :  { %v3043_v25 = vmax.f32 %v3037_v22, 0.0  ;;  %v3041_v28 = vpop.f32.mrb[15].mxu1 }
 0x56d   :  { %v3044_v29 = vmax.f32 %v3039_v9, 0.0 }
 0x56f   :  { %v3045_v60 = vmax.f32 %v3043_v25, %v3044_v29 }
 0x570   :  { %4395 = dma.done.wait [#allocation6 + $0x2], 1024 }
 0x571   :  { %4396 = vsyncadd [#allocation6 + $0x2], 4294966272  ;;  %v4428_v30 = vmov 0.0   ;;  %vm4429_vm2 = vmmov 0   ;;  %v3051_v21 = vld [vmem:[#allocation4] sm:$0xff]  ;;  %v3052_v24 = vld [vmem:[#allocation4 + $0x8] sm:$0xff]  ;;  %v3050_v34 = vpack.c.bf16 %v3045_v60, %v3045_v60 }
 0x572   :  { %3568 = vmatprep.subr.bf16.mxu1 %v4428_v30  ;;  %3584 = vmatprep.mubr.msk.bf16.mxu1 %vm4429_vm2, %v4428_v30  ;;  %v3053_v26 = vld [vmem:[#allocation4 + $0x10] sm:$0xff]  ;;  %v3054_v13 = vld [vmem:[#allocation4 + $0x18] sm:$0xff]  ;;  %v3055_v31 = vld [vmem:[#allocation4 + $0x20] sm:$0xff] }
 0x573   :  { %3569 = vmatpush3.bf16.msra.mxu1 %v3051_v21  ;;  %v3056_v49 = vld [vmem:[#allocation4 + $0x28] sm:$0xff]  ;;  %v3057_v32 = vld [vmem:[#allocation4 + $0x30] sm:$0xff]  ;;  %v3058_v33 = vld [vmem:[#allocation4 + $0x38] sm:$0xff] }
 0x574   :  { %3570 = vmatprep.subr.bf16.mxu1 %v4428_v30  ;;  %v3544_v35 = vld [vmem:[#allocation16] ss:$0 sm:$0xff] }
 0x577   :  { %3571 = vmatpush3.bf16.msra.mxu1 %v3052_v24 }
 0x578   :  { %3572 = vmatprep.subr.bf16.mxu1 %v4428_v30 }
 0x57b   :  { %3573 = vmatpush3.bf16.msra.mxu1 %v3053_v26 }
 0x57c   :  { %3574 = vmatprep.subr.bf16.mxu1 %v4428_v30 }
 0x57f   :  { %3575 = vmatpush3.bf16.msra.mxu1 %v3054_v13 }
 0x580   :  { %3576 = vmatprep.subr.bf16.mxu1 %v4428_v30 }
 0x583   :  { %3577 = vmatpush3.bf16.msra.mxu1 %v3055_v31 }
 0x584   :  { %3578 = vmatprep.subr.bf16.mxu1 %v4428_v30 }
 0x587   :  { %3579 = vmatpush3.bf16.msra.mxu1 %v3056_v49 }
 0x588   :  { %3580 = vmatprep.subr.bf16.mxu1 %v4428_v30 }
 0x58b   :  { %3581 = vmatpush3.bf16.msra.mxu1 %v3057_v32 }
 0x58c   :  { %3582 = vmatprep.subr.bf16.mxu1 %v4428_v30 }
 0x58f   :  { %3583 = vmatpush3.bf16.msra.mxu1 %v3058_v33 }
 0x592   :  { %3585 = vmatmul.mubr.bf16.vlgmr.msra.gmra.mrb[16].mxu1 %v3050_v34 }
 0x665   :  { %v3100_v36 = vpop.f32.mrb[16].mxu1 }
 0x666   :  { %v3101_v37 = vadd.f32 %v3544_v35, %v3100_v36  ;;  %v3586_v27 = vpop.f32.mrb[17].mxu1 }
 0x667   :  { %v3103_v38 = vpop.f32.mrb[18].mxu1 }
 0x668   :  { %v3106_v39 = vmax.f32 %v3101_v37, 0.0  ;;  %v3587_v43 = vpop.f32.mrb[19].mxu1 }
 0x669   :  { %4397 = dma.done.wait [#allocation6 + $0x3], 1024 }
 0x66a   :  { %4398 = vsyncadd [#allocation6 + $0x3], 4294966272  ;;  %3588 = vmatprep.subr.bf16.mxu1 %v4428_v30  ;;  %3604 = vmatprep.mubr.msk.bf16.mxu1 %vm4429_vm2, %v4428_v30  ;;  %v3110_v16 = vld [vmem:[#allocation5] sm:$0xff]  ;;  %v3111_v40 = vld [vmem:[#allocation5 + $0x8] sm:$0xff]  ;;  %v3109_v47 = vpack.c.bf16 %v3106_v39, %v3106_v39  ;;  %s4430_s10 = smov [#allocation20]  }
 0x66b   :  { %3589 = vmatpush3.bf16.msra.mxu1 %v3110_v16  ;;  %v3112_v41 = vld [vmem:[#allocation5 + $0x10] sm:$0xff]  ;;  %v3113_v42 = vld [vmem:[#allocation5 + $0x18] sm:$0xff]  ;;  %v3114_v44 = vld [vmem:[#allocation5 + $0x20] sm:$0xff]  ;;  %s3182_s15 = sshll.u32 %s4430_s10, 4  ;;  %s3183_s15 = int_to_ptr.vmem [resolvable:$true] %s3182_s15 }
 0x66c   :  { %3590 = vmatprep.subr.bf16.mxu1 %v4428_v30  ;;  %v3115_v58 = vld [vmem:[#allocation5 + $0x28] sm:$0xff]  ;;  %v3116_v45 = vld [vmem:[#allocation5 + $0x30] sm:$0xff]  ;;  %v3117_v46 = vld [vmem:[#allocation5 + $0x38] sm:$0xff]  ;;  %s4317_s0 = scalar_lea.vmem %s3183_s15, 160  ;;  %p4322_p3 = scmp.lt.s32.totalorder %s3183_s15, %s3183_s15 }
 0x66d   :  { %p4318_p2 = scmp.ne.s32.totalorder %s3183_s15, %s4317_s0  ;;  %p4323_p4 = scmp.lt.s32.totalorder %s4317_s0, %s4317_s0 }
 0x66f   :  { %3591 = vmatpush3.bf16.msra.mxu1 %v3111_v40  ;;  %p4324_p5 = por %p4323_p4, %p4322_p3 }
 0x670   :  { %3592 = vmatprep.subr.bf16.mxu1 %v4428_v30 }
 0x671   :  { %p4325_p6 = pnand %p4324_p5, %p4318_p2 }
 0x673   :  { %3593 = vmatpush3.bf16.msra.mxu1 %v3112_v41 }
 0x674   :  { %3594 = vmatprep.subr.bf16.mxu1 %v4428_v30 }
 0x677   :  { %3595 = vmatpush3.bf16.msra.mxu1 %v3113_v42 }
 0x678   :  { %3596 = vmatprep.subr.bf16.mxu1 %v4428_v30 }
 0x67b   :  { %3597 = vmatpush3.bf16.msra.mxu1 %v3114_v44 }
 0x67c   :  { %3598 = vmatprep.subr.bf16.mxu1 %v4428_v30 }
 0x67f   :  { %3599 = vmatpush3.bf16.msra.mxu1 %v3115_v58 }
 0x680   :  { %3600 = vmatprep.subr.bf16.mxu1 %v4428_v30 }
 0x683   :  { %3601 = vmatpush3.bf16.msra.mxu1 %v3116_v45 }
 0x684   :  { %3602 = vmatprep.subr.bf16.mxu1 %v4428_v30 }
 0x687   :  { %3603 = vmatpush3.bf16.msra.mxu1 %v3117_v46 }
 0x68a   :  { %3605 = vmatmul.mubr.bf16.vlgmr.msra.gmra.mrb[20].mxu1 %v3109_v47 }
 0x68b   :  { %4328 = shalt.err (!%p4325_p6)
}
 0x68c   :  { %s4329_s8 = scalar_lea.hbm %s4791_s12, 160 }
 0x68d   :  { %p4330_p7 = scmp.ne.s32.totalorder %s4791_s12, %s4329_s8  ;;  %p4333_p8 = scmp.lt.u32.totalorder %s4329_s8, %s4791_s12 }
 0x68f   :  { %p4335_p9 = pnand %p4333_p8, %p4330_p7 }
 0x691   :  { %4338 = shalt.err (!%p4335_p9)
}
 0x692   :  { %3185 = dma.vmem_to_hbm [thread:$0]  %s3183_s15, 160, %s4791_s12, [#allocation21]  }
 0x693   :  { %s4431_s21 = smov [#allocation22]  }
 0x694   :  { %s3192_s5 = sshll.u32 %s4431_s21, 4  ;;  %s3193_s5 = int_to_ptr.vmem [resolvable:$true] %s3192_s5 }
 0x695   :  { %s4339_s25 = scalar_lea.vmem %s3193_s5, 64  ;;  %p4344_p11 = scmp.lt.s32.totalorder %s3193_s5, %s3193_s5 }
 0x696   :  { %p4340_p10 = scmp.ne.s32.totalorder %s3193_s5, %s4339_s25  ;;  %p4345_p12 = scmp.lt.s32.totalorder %s4339_s25, %s4339_s25 }
 0x698   :  { %p4346_p13 = por %p4345_p12, %p4344_p11 }
 0x69a   :  { %p4347_p0 = pnand %p4346_p13, %p4340_p10 }
 0x69c   :  { %4350 = shalt.err (!%p4347_p0)
}
 0x69d   :  { %s4351_s22 = scalar_lea.hbm %s4792_s13, 64 }
 0x69e   :  { %p4352_p1 = scmp.ne.s32.totalorder %s4792_s13, %s4351_s22  ;;  %p4355_p2 = scmp.lt.u32.totalorder %s4351_s22, %s4792_s13 }
 0x6a0   :  { %p4357_p3 = pnand %p4355_p2, %p4352_p1 }
 0x6a2   :  { %4360 = shalt.err (!%p4357_p3)
}
 0x6a3   :  { %3195 = dma.vmem_to_hbm [thread:$0]  %s3193_s5, 64, %s4792_s13, [#allocation21]   ;;  %v3545_v48 = vld [vmem:[#allocation18] ss:$0 sm:$0xff] }
 0x6a4   :  { %s4432_s29 = smov [#allocation19]  }
 0x6a5   :  { %s3172_s3 = sshll.u32 %s4432_s29, 4  ;;  %s3173_s3 = int_to_ptr.vmem [resolvable:$true] %s3172_s3 }
 0x6a6   :  { %s4361_s9 = scalar_lea.vmem %s3173_s3, 32  ;;  %p4366_p5 = scmp.lt.s32.totalorder %s3173_s3, %s3173_s3 }
 0x6a7   :  { %p4362_p4 = scmp.ne.s32.totalorder %s3173_s3, %s4361_s9  ;;  %p4367_p6 = scmp.lt.s32.totalorder %s4361_s9, %s4361_s9 }
 0x6a9   :  { %p4368_p7 = por %p4367_p6, %p4366_p5 }
 0x6ab   :  { %p4369_p8 = pnand %p4368_p7, %p4362_p4 }
 0x75d   :  { %v3159_v19 = vpop.f32.mrb[20].mxu1 }
 0x75e   :  { %v3160_v50 = vadd.f32 %v3545_v48, %v3159_v19  ;;  %v3606_v51 = vpop.f32.mrb[21].mxu1 }
 0x75f   :  { %v3162_v52 = vpop.f32.mrb[22].mxu1 }
 0x760   :  { %3165 = vst [vmem:[#allocation19] sm:$0x3] %v3160_v50  ;;  %v3607_v53 = vpop.f32.mrb[23].mxu1 }
 0x761   :  { %4372 = shalt.err (!%p4369_p8)
}
 0x762   :  { %s4373_s13 = scalar_lea.hbm %s4790_s11, 32 }
 0x763   :  { %p4374_p9 = scmp.ne.s32.totalorder %s4790_s11, %s4373_s13  ;;  %p4377_p10 = scmp.lt.u32.totalorder %s4373_s13, %s4790_s11 }
 0x765   :  { %p4379_p11 = pnand %p4377_p10, %p4374_p9 }
 0x767   :  { %4382 = shalt.err (!%p4379_p11)
}
 0x768   :  { %3175 = dma.vmem_to_hbm [thread:$0]  %s3173_s3, 32, %s4790_s11, [#allocation9]  }
 0x769   :  { %4399 = dma.done.wait [#allocation9], 32  }
 0x76a   :  { %4400 = vsyncadd [#allocation9], 4294967264 }
 0x76b   :  { %4401 = dma.done.wait [#allocation21], 224  }
 0x76c   :  { %4402 = vsyncadd [#allocation21], 4294967072 }
 0x76d   :  { %3205 = vsyncpa [#allocation8], 1 }
 0x76e   :  { %3206 = vsyncpa [#allocation11], 1 }
 0x76f   :  { %3207 = vsyncpa [#allocation14], 1 }
 0x770   :  { %3208 = vsyncpa [#allocation17], 1 }
 0x771   :  { %3209 = vsyncpa [#allocation9], 1 }
 0x772   :  { %3210 = vsyncpa [#allocation21], 1 }
 0x773   :  { %3211 = vsyncmov [#allocation6] }
 0x776   :  { %s3212_s1 = vpop.sfrf %3211 }
 0x777   :  { %p3546_p12 = scmp.ne.s32.totalorder %s3212_s1, 0 }
 0x779   :  { %3216 = shalt.err (%p3546_p12)  }
 0x77a   :  { %3218 = vsyncmov [#allocation6 + $0x1] }
 0x77d   :  { %s3219_s4 = vpop.sfrf %3218 }
 0x77e   :  { %p3547_p13 = scmp.ne.s32.totalorder %s3219_s4, 0 }
 0x780   :  { %3223 = shalt.err (%p3547_p13)  }
 0x781   :  { %3225 = vsyncmov [#allocation6 + $0x2] }
 0x784   :  { %s3226_s11 = vpop.sfrf %3225 }
 0x785   :  { %p3548_p0 = scmp.ne.s32.totalorder %s3226_s11, 0 }
 0x787   :  { %3230 = shalt.err (%p3548_p0)  }
 0x788   :  { %3232 = vsyncmov [#allocation6 + $0x3] }
 0x78b   :  { %s3233_s26 = vpop.sfrf %3232 }
 0x78c   :  { %p3549_p1 = scmp.ne.s32.totalorder %s3233_s26, 0 }
 0x78e   :  { %3237 = shalt.err (%p3549_p1)  }

</bundles_post_ra>
